<compile_context>
chip_gen: v6e
topology: v6e:2x2x1
jax: 0.10.0
libtpu: 0.0.40
codegen_flags: <defaults>
</compile_context>

<pallas_src>
import functools
import math

import jax
import jax.numpy as jnp
from jax.experimental import pallas as pl
from jax.experimental.pallas import tpu as pltpu


PARAM_ORDER = (
    "q_w", "k_w", "v_w", "q_b", "k_b", "v_b",
    "o_w", "o_b", "g1", "be1",
    "w1", "b1", "w2", "b2", "g2", "be2",
)


def _layer_norm(x, gamma, beta, eps=1e-5):
    # Fused single reduction pass: var = E[x^2] - E[x]^2 (eps guards the rsqrt).
    mean = jnp.mean(x, axis=-1, keepdims=True)
    mean_sq = jnp.mean(x * x, axis=-1, keepdims=True)
    var = mean_sq - mean * mean
    return (x - mean) * jax.lax.rsqrt(var + eps) * gamma + beta


def transformer_encoder_kernel(
    x_ref,
    q_w_ref, k_w_ref, v_w_ref, q_b_ref, k_b_ref, v_b_ref,
    o_w_ref, o_b_ref, g1_ref, be1_ref,
    w1_ref, b1_ref, w2_ref, b2_ref, g2_ref, be2_ref,
    out_ref,
    x_sc,                       # VMEM (bt*S, D) f32 residual-stream carry
    *, num_heads,
):
    # TODO(synk): attention / key-padding mask support omitted (forward is only
    # exercised with mask=None in the reference pipeline).
    layer = pl.program_id(1)
    bt, seq, dim = x_ref.shape
    hd = dim // num_heads
    rows = bt * seq

    @pl.when(layer == 0)
    def _():
        # seq is a multiple of 8 -> this reshape is layout-preserving.
        x_sc[...] = x_ref[...].reshape(rows, dim).astype(jnp.float32)

    x = x_sc[...]
    xb = x.astype(jnp.bfloat16)

    # ---- QKV projections: full-width bf16 MXU matmuls, f32 accumulation.
    # (1/sqrt(hd) already folded into q_w / q_b on the host.)
    q = jnp.dot(xb, q_w_ref[...], preferred_element_type=jnp.float32) + q_b_ref[...]
    k = jnp.dot(xb, k_w_ref[...], preferred_element_type=jnp.float32) + k_b_ref[...]
    v = jnp.dot(xb, v_w_ref[...], preferred_element_type=jnp.float32) + v_b_ref[...]

    # ---- Attention core, batched over the folded batch rows per head.
    # o_proj is row-split per head (o_w stored as (H, hd, D)), so
    #   vals @ o_w == sum_h vals_h @ o_w[h]
    # and no (rows, D) scratch, masked column store or lane concat is needed.
    head_out = []
    for h in range(num_heads):
        lo = h * hd
        q_h = q[:, lo:lo + hd].reshape(bt, seq, hd).astype(jnp.bfloat16)
        k_h = k[:, lo:lo + hd].reshape(bt, seq, hd).astype(jnp.bfloat16)
        v_h = v[:, lo:lo + hd].reshape(bt, seq, hd).astype(jnp.bfloat16)

        logits = jnp.einsum("bqd,bkd->bqk", q_h, k_h,
                            preferred_element_type=jnp.float32)
        m = jnp.max(logits, axis=-1, keepdims=True)
        p = jnp.exp(logits - m)
        denom = jnp.sum(p, axis=-1, keepdims=True)
        attn = p * pl.reciprocal(denom, approx=True)

        vals_h = jnp.einsum("bqk,bkd->bqd", attn.astype(jnp.bfloat16), v_h,
                            preferred_element_type=jnp.float32)
        head_out.append(
            jnp.dot(vals_h.astype(jnp.bfloat16).reshape(rows, hd), o_w_ref[h],
                    preferred_element_type=jnp.float32))
    attn_out = sum(head_out) + o_b_ref[...]

    # ---- Residual + LayerNorm 1 (dropout p=0.0 -> identity).
    x = _layer_norm(x + attn_out, g1_ref[...], be1_ref[...])

    # ---- Feed-forward.
    h1 = jnp.dot(x.astype(jnp.bfloat16), w1_ref[...],
                 preferred_element_type=jnp.float32) + b1_ref[...]
    h1 = jnp.maximum(h1, 0.0)
    ff = jnp.dot(h1.astype(jnp.bfloat16), w2_ref[...],
                 preferred_element_type=jnp.float32) + b2_ref[...]

    # ---- Residual + LayerNorm 2.
    x = _layer_norm(x + ff, g2_ref[...], be2_ref[...])

    # Carry the f32 residual stream to the next layer grid step.
    x_sc[...] = x

    @pl.when(layer == pl.num_programs(1) - 1)
    def _():
        out_ref[...] = x.reshape(bt, seq, dim).astype(out_ref.dtype)


def _pick_block_batch(batch, seq, target_rows=512):
    """Largest divisor of `batch` whose folded row count fits `target_rows`,
    while keeping >= 2 batch grid blocks (so both v7x TensorCores get work)."""
    best = 1
    for cand in range(1, batch + 1):
        if batch % cand:
            continue
        if cand * seq > max(target_rows, seq):
            continue
        if batch >= 2 and batch // cand < 2:
            continue
        best = cand
    return best


def _vmem_limit_bytes():
    """Generation-aware VMEM budget with real headroom under physical VMEM
    (v7x: 64 MiB -> ~48 MiB; v5e/v6e: 128 MiB -> ~110 MiB)."""
    default = 48 * 1024 * 1024
    try:
        cap = int(pltpu.get_tpu_info().vmem_capacity_bytes)
    except Exception:
        return default
    return max(min(cap - 16 * 1024 * 1024, 110 * 1024 * 1024), 32 * 1024 * 1024)


def transformer_encoder_forward(x, stacked_params, num_heads, *, block_batch=None):
    B, S, D = x.shape
    L = stacked_params["q_w"].shape[0]
    bt = block_batch if block_batch is not None else _pick_block_batch(B, S)
    assert B % bt == 0, "block_batch must divide batch"

    kernel = functools.partial(transformer_encoder_kernel, num_heads=num_heads)

    def layer_spec(arr):
        # Stream one layer's block per grid step l; leading layer axis squeezed.
        trailing = arr.shape[1:]
        zeros = (0,) * len(trailing)
        return pl.BlockSpec((None,) + trailing, lambda b, l, _z=zeros: (l,) + _z)

    params = [stacked_params[name] for name in PARAM_ORDER]
    in_specs = [pl.BlockSpec((bt, S, D), lambda b, l: (b, 0, 0))]
    in_specs += [layer_spec(a) for a in params]

    return pl.pallas_call(
        kernel,
        out_shape=jax.ShapeDtypeStruct((B, S, D), x.dtype),
        grid=(B // bt, L),
        in_specs=in_specs,
        out_specs=pl.BlockSpec((bt, S, D), lambda b, l: (b, 0, 0)),
        scratch_shapes=[pltpu.VMEM((bt * S, D), jnp.float32)],
        compiler_params=pltpu.CompilerParams(
            dimension_semantics=("parallel", "arbitrary"),  # batch blocks independent
            vmem_limit_bytes=_vmem_limit_bytes(),
        ),
    )(x, *params)


def prepare_params(layer_params, num_heads):
    """Convert per-layer PyTorch-style params into the stacked kernel layout.

    qkv_proj output columns follow the spec's reshape(B,S,H,3*hd)+chunk(3)
    convention (per-head [q_h|k_h|v_h] blocks); they are split into head-major
    q_w/k_w/v_w of shape (D, D) with 1/sqrt(hd) folded into q.  o_proj weight is
    row-split per head into (H, hd, D) so the kernel can accumulate head
    contributions directly.  Matmul weights are bf16; everything is stacked
    along a leading layer axis for per-layer streaming.
    """
    prepped = []
    for p in layer_params:
        D = p["qkv_w"].shape[0]
        Fd = p["w1"].shape[1]
        hd = D // num_heads
        scale = 1.0 / math.sqrt(hd)
        w3 = p["qkv_w"].reshape(D, num_heads, 3, hd)
        b3 = p["qkv_b"].reshape(num_heads, 3, hd)
        prepped.append(dict(
            q_w=(w3[:, :, 0, :].reshape(D, D) * scale).astype(jnp.bfloat16),
            k_w=w3[:, :, 1, :].reshape(D, D).astype(jnp.bfloat16),
            v_w=w3[:, :, 2, :].reshape(D, D).astype(jnp.bfloat16),
            q_b=(b3[:, 0, :].reshape(1, D) * scale).astype(jnp.float32),
            k_b=b3[:, 1, :].reshape(1, D).astype(jnp.float32),
            v_b=b3[:, 2, :].reshape(1, D).astype(jnp.float32),
            o_w=p["o_w"].reshape(num_heads, hd, D).astype(jnp.bfloat16),
            o_b=p["o_b"].reshape(1, D).astype(jnp.float32),
            g1=p["g1"].reshape(1, D).astype(jnp.float32),
            be1=p["be1"].reshape(1, D).astype(jnp.float32),
            w1=p["w1"].astype(jnp.bfloat16),
            b1=p["b1"].reshape(1, Fd).astype(jnp.float32),
            w2=p["w2"].astype(jnp.bfloat16),
            b2=p["b2"].reshape(1, D).astype(jnp.float32),
            g2=p["g2"].reshape(1, D).astype(jnp.float32),
            be2=p["be2"].reshape(1, D).astype(jnp.float32),
        ))
    return {name: jnp.stack([lp[name] for lp in prepped], axis=0)
            for name in PARAM_ORDER}


def init_params(key, num_layers, input_dim, dim_feedforward):
    D, Fd = input_dim, dim_feedforward

    def xavier(k, fan_in, fan_out):
        lim = math.sqrt(6.0 / (fan_in + fan_out))
        return jax.random.uniform(k, (fan_in, fan_out), jnp.float32, -lim, lim)

    layers = []
    for l in range(num_layers):
        k = jax.random.fold_in(key, l)
        k0, k1, k2, k3, k4, k5 = jax.random.split(k, 6)
        lim1 = 1.0 / math.sqrt(D)
        lim2 = 1.0 / math.sqrt(Fd)
        layers.append(dict(
            qkv_w=xavier(k0, D, 3 * D),
            qkv_b=jnp.zeros((3 * D,), jnp.float32),
            o_w=xavier(k1, D, D),
            o_b=jnp.zeros((D,), jnp.float32),
            g1=jnp.ones((D,), jnp.float32),
            be1=jnp.zeros((D,), jnp.float32),
            w1=jax.random.uniform(k2, (D, Fd), jnp.float32, -lim1, lim1),
            b1=jax.random.uniform(k3, (Fd,), jnp.float32, -lim1, lim1),
            w2=jax.random.uniform(k4, (Fd, D), jnp.float32, -lim2, lim2),
            b2=jax.random.uniform(k5, (D,), jnp.float32, -lim2, lim2),
            g2=jnp.ones((D,), jnp.float32),
            be2=jnp.zeros((D,), jnp.float32),
        ))
    return layers


def reference_forward(x, layer_params, num_heads):
    """Pure-JAX f32 reference mirroring the PyTorch module exactly."""
    B, S, D = x.shape
    hd = D // num_heads
    for p in layer_params:
        qkv = x @ p["qkv_w"] + p["qkv_b"]                          # (B,S,3D)
        qkv = qkv.reshape(B, S, num_heads, 3 * hd).transpose(0, 2, 1, 3)
        q, k, v = jnp.split(qkv, 3, axis=-1)                       # (B,H,S,hd)
        logits = jnp.einsum("bhqd,bhkd->bhqk", q, k) / math.sqrt(hd)
        attn = jax.nn.softmax(logits, axis=-1)
        vals = jnp.einsum("bhqk,bhkd->bhqd", attn, v)
        vals = vals.transpose(0, 2, 1, 3).reshape(B, S, D)
        attn_out = vals @ p["o_w"] + p["o_b"]
        x = _layer_norm(x + attn_out, p["g1"], p["be1"])
        h1 = jax.nn.relu(x @ p["w1"] + p["b1"])
        ff = h1 @ p["w2"] + p["b2"]
        x = _layer_norm(x + ff, p["g2"], p["be2"])
    return x


if __name__ == "__main__":
    # Small shapes: batch=2, seq=8, input_dim=32, heads=4, ffn=64, layers=2.
    B, S, D, H, Fd, L = 2, 8, 32, 4, 64, 2
    key = jax.random.PRNGKey(0)
    kx, kp = jax.random.split(key)
    x = jax.random.normal(kx, (B, S, D), dtype=jnp.float32)

    layer_params = init_params(kp, L, D, Fd)
    stacked = prepare_params(layer_params, num_heads=H)

    out = transformer_encoder_forward(x, stacked, num_heads=H)
    jax.block_until_ready(out)

    assert out.shape == (B, S, D)
    assert bool(jnp.all(jnp.isfinite(out)))

    # Parity check vs. pure-JAX f32 reference (kernel matmuls run in bf16 and
    # the softmax uses the EUP approx reciprocal, so tolerance is bf16-level).
    ref = reference_forward(x, layer_params, num_heads=H)
    max_err = float(jnp.max(jnp.abs(out.astype(jnp.float32) - ref)))
    assert max_err < 0.25, f"kernel/reference mismatch: max abs err = {max_err}"

    print("KERNEL_OK")
</pallas_src>

<mosaic_0001>
module attributes {stable_mosaic.version = 11 : i64} {
  func.func @transformer_encoder_kernel(%arg0: i32, %arg1: i32, %arg2: memref<1x8x32xf32, #tpu.memory_space<vmem>>, %arg3: memref<1x32x32xbf16, #tpu.memory_space<vmem>>, %arg4: memref<1x32x32xbf16, #tpu.memory_space<vmem>>, %arg5: memref<1x32x32xbf16, #tpu.memory_space<vmem>>, %arg6: memref<1x1x32xf32, #tpu.memory_space<vmem>>, %arg7: memref<1x1x32xf32, #tpu.memory_space<vmem>>, %arg8: memref<1x1x32xf32, #tpu.memory_space<vmem>>, %arg9: memref<1x4x8x32xbf16, #tpu.memory_space<vmem>>, %arg10: memref<1x1x32xf32, #tpu.memory_space<vmem>>, %arg11: memref<1x1x32xf32, #tpu.memory_space<vmem>>, %arg12: memref<1x1x32xf32, #tpu.memory_space<vmem>>, %arg13: memref<1x32x64xbf16, #tpu.memory_space<vmem>>, %arg14: memref<1x1x64xf32, #tpu.memory_space<vmem>>, %arg15: memref<1x64x32xbf16, #tpu.memory_space<vmem>>, %arg16: memref<1x1x32xf32, #tpu.memory_space<vmem>>, %arg17: memref<1x1x32xf32, #tpu.memory_space<vmem>>, %arg18: memref<1x1x32xf32, #tpu.memory_space<vmem>>, %arg19: memref<1x8x32xf32, #tpu.memory_space<vmem>>, %arg20: memref<8x32xf32, #tpu.memory_space<vmem>>) attributes {dimension_semantics = [#tpu.dimension_semantics<parallel>, #tpu.dimension_semantics<arbitrary>], iteration_bounds = array<i64: 2, 2>, scalar_prefetch = 0 : i64, scratch_operands = 1 : i64, tpu.core_type = #tpu.core_type<tc>, window_params = [{transform_indices = @transform_0, window_bounds = array<i64: 1, 8, 32>}, {transform_indices = @transform_1, window_bounds = array<i64: 1, 32, 32>}, {transform_indices = @transform_2, window_bounds = array<i64: 1, 32, 32>}, {transform_indices = @transform_3, window_bounds = array<i64: 1, 32, 32>}, {transform_indices = @transform_4, window_bounds = array<i64: 1, 1, 32>}, {transform_indices = @transform_5, window_bounds = array<i64: 1, 1, 32>}, {transform_indices = @transform_6, window_bounds = array<i64: 1, 1, 32>}, {transform_indices = @transform_7, window_bounds = array<i64: 1, 4, 8, 32>}, {transform_indices = @transform_8, window_bounds = array<i64: 1, 1, 32>}, {transform_indices = @transform_9, window_bounds = array<i64: 1, 1, 32>}, {transform_indices = @transform_10, window_bounds = array<i64: 1, 1, 32>}, {transform_indices = @transform_11, window_bounds = array<i64: 1, 32, 64>}, {transform_indices = @transform_12, window_bounds = array<i64: 1, 1, 64>}, {transform_indices = @transform_13, window_bounds = array<i64: 1, 64, 32>}, {transform_indices = @transform_14, window_bounds = array<i64: 1, 1, 32>}, {transform_indices = @transform_15, window_bounds = array<i64: 1, 1, 32>}, {transform_indices = @transform_16, window_bounds = array<i64: 1, 1, 32>}, {transform_indices = @transform_17, window_bounds = array<i64: 1, 8, 32>}]} {
    %c0_i32 = arith.constant 0 : i32
    %0 = arith.cmpi eq, %arg1, %c0_i32 : i32
    %1 = arith.extui %0 : i1 to i32
    %c0_i32_0 = arith.constant 0 : i32
    %2 = arith.cmpi ne, %1, %c0_i32_0 : i32
    scf.if %2 {
      %c0_99 = arith.constant 0 : index
      %c0_100 = arith.constant 0 : index
      %c0_101 = arith.constant 0 : index
      %219 = vector.load %arg2[%c0_99, %c0_100, %c0_101] : memref<1x8x32xf32, #tpu.memory_space<vmem>>, vector<1x8x32xf32>
      %220 = vector.shape_cast %219 : vector<1x8x32xf32> to vector<8x32xf32>
      %c0_102 = arith.constant 0 : index
      %c0_103 = arith.constant 0 : index
      %221 = vector.load %arg20[%c0_102, %c0_103] : memref<8x32xf32, #tpu.memory_space<vmem>>, vector<8x32xf32>
      tpu.vector_store %arg20[%c0_102, %c0_103], %220 {strides = array<i32>} : memref<8x32xf32, #tpu.memory_space<vmem>>, vector<8x32xf32>,
    } else {
    }
    %c0 = arith.constant 0 : index
    %c0_1 = arith.constant 0 : index
    %3 = vector.load %arg20[%c0, %c0_1] : memref<8x32xf32, #tpu.memory_space<vmem>>, vector<8x32xf32>
    %4 = arith.truncf %3 : vector<8x32xf32> to vector<8x32xbf16>
    %c0_2 = arith.constant 0 : index
    %c0_3 = arith.constant 0 : index
    %c0_4 = arith.constant 0 : index
    %5 = vector.load %arg3[%c0_2, %c0_3, %c0_4] : memref<1x32x32xbf16, #tpu.memory_space<vmem>>, vector<1x32x32xbf16>
    %6 = vector.shape_cast %5 : vector<1x32x32xbf16> to vector<32x32xbf16>
    %cst = arith.constant dense<0.000000e+00> : vector<8x32xf32>
    %7 = tpu.matmul %4, %6, %cst {dimension_numbers = #tpu.dot_dimension_numbers<[1], [0], [0], [1], [0, 0, 1, 1], [], []>} : vector<8x32xbf16>, vector<32x32xbf16>, vector<8x32xf32> -> vector<8x32xf32>
    %c0_5 = arith.constant 0 : index
    %c0_6 = arith.constant 0 : index
    %c0_7 = arith.constant 0 : index
    %8 = vector.load %arg6[%c0_5, %c0_6, %c0_7] : memref<1x1x32xf32, #tpu.memory_space<vmem>>, vector<1x1x32xf32>
    %9 = vector.shape_cast %8 : vector<1x1x32xf32> to vector<1x32xf32>
    %10 = vector.broadcast %9 : vector<1x32xf32> to vector<8x32xf32>
    %11 = arith.addf %7, %10 : vector<8x32xf32>
    %c0_8 = arith.constant 0 : index
    %c0_9 = arith.constant 0 : index
    %c0_10 = arith.constant 0 : index
    %12 = vector.load %arg4[%c0_8, %c0_9, %c0_10] : memref<1x32x32xbf16, #tpu.memory_space<vmem>>, vector<1x32x32xbf16>
    %13 = vector.shape_cast %12 : vector<1x32x32xbf16> to vector<32x32xbf16>
    %cst_11 = arith.constant dense<0.000000e+00> : vector<8x32xf32>
    %14 = tpu.matmul %4, %13, %cst_11 {dimension_numbers = #tpu.dot_dimension_numbers<[1], [0], [0], [1], [0, 0, 1, 1], [], []>} : vector<8x32xbf16>, vector<32x32xbf16>, vector<8x32xf32> -> vector<8x32xf32>
    %c0_12 = arith.constant 0 : index
    %c0_13 = arith.constant 0 : index
    %c0_14 = arith.constant 0 : index
    %15 = vector.load %arg7[%c0_12, %c0_13, %c0_14] : memref<1x1x32xf32, #tpu.memory_space<vmem>>, vector<1x1x32xf32>
    %16 = vector.shape_cast %15 : vector<1x1x32xf32> to vector<1x32xf32>
    %17 = vector.broadcast %16 : vector<1x32xf32> to vector<8x32xf32>
    %18 = arith.addf %14, %17 : vector<8x32xf32>
    %c0_15 = arith.constant 0 : index
    %c0_16 = arith.constant 0 : index
    %c0_17 = arith.constant 0 : index
    %19 = vector.load %arg5[%c0_15, %c0_16, %c0_17] : memref<1x32x32xbf16, #tpu.memory_space<vmem>>, vector<1x32x32xbf16>
    %20 = vector.shape_cast %19 : vector<1x32x32xbf16> to vector<32x32xbf16>
    %cst_18 = arith.constant dense<0.000000e+00> : vector<8x32xf32>
    %21 = tpu.matmul %4, %20, %cst_18 {dimension_numbers = #tpu.dot_dimension_numbers<[1], [0], [0], [1], [0, 0, 1, 1], [], []>} : vector<8x32xbf16>, vector<32x32xbf16>, vector<8x32xf32> -> vector<8x32xf32>
    %c0_19 = arith.constant 0 : index
    %c0_20 = arith.constant 0 : index
    %c0_21 = arith.constant 0 : index
    %22 = vector.load %arg8[%c0_19, %c0_20, %c0_21] : memref<1x1x32xf32, #tpu.memory_space<vmem>>, vector<1x1x32xf32>
    %23 = vector.shape_cast %22 : vector<1x1x32xf32> to vector<1x32xf32>
    %24 = vector.broadcast %23 : vector<1x32xf32> to vector<8x32xf32>
    %25 = arith.addf %21, %24 : vector<8x32xf32>
    %26 = vector.extract_strided_slice %11 {offsets = [0, 0], sizes = [8, 8], strides = [1, 1]} : vector<8x32xf32> to vector<8x8xf32>
    %27 = vector.shape_cast %26 : vector<8x8xf32> to vector<1x8x8xf32>
    %28 = arith.truncf %27 : vector<1x8x8xf32> to vector<1x8x8xbf16>
    %29 = vector.extract_strided_slice %18 {offsets = [0, 0], sizes = [8, 8], strides = [1, 1]} : vector<8x32xf32> to vector<8x8xf32>
    %30 = vector.shape_cast %29 : vector<8x8xf32> to vector<1x8x8xf32>
    %31 = arith.truncf %30 : vector<1x8x8xf32> to vector<1x8x8xbf16>
    %32 = vector.extract_strided_slice %25 {offsets = [0, 0], sizes = [8, 8], strides = [1, 1]} : vector<8x32xf32> to vector<8x8xf32>
    %33 = vector.shape_cast %32 : vector<8x8xf32> to vector<1x8x8xf32>
    %34 = arith.truncf %33 : vector<1x8x8xf32> to vector<1x8x8xbf16>
    "tpu.trace_start"() <{level = 10 : i32, message = "bqd,bkd->bqk"}> : () -> ()
    %cst_22 = arith.constant dense<0.000000e+00> : vector<1x8x8xf32>
    %35 = tpu.matmul %28, %31, %cst_22 {dimension_numbers = #tpu.dot_dimension_numbers<[2], [2], [1], [1], [0, 0, 0, 1, 1, 1], [0], [0]>} : vector<1x8x8xbf16>, vector<1x8x8xbf16>, vector<1x8x8xf32> -> vector<1x8x8xf32>
    "tpu.trace_stop"() : () -> ()
    %cst_23 = arith.constant dense<0xFF800000> : vector<1x8xf32>
    %36 = vector.multi_reduction <maximumf>, %35, %cst_23 [2] : vector<1x8x8xf32> to vector<1x8xf32>
    %37 = vector.shape_cast %36 : vector<1x8xf32> to vector<1x8x1xf32>
    %38 = vector.broadcast %37 : vector<1x8x1xf32> to vector<1x8x8xf32>
    %39 = arith.subf %35, %38 : vector<1x8x8xf32>
    %40 = math.exp %39 : vector<1x8x8xf32>
    %cst_24 = arith.constant dense<0.000000e+00> : vector<1x8xf32>
    %41 = vector.multi_reduction <add>, %40, %cst_24 [2] : vector<1x8x8xf32> to vector<1x8xf32>
    %42 = vector.shape_cast %41 : vector<1x8xf32> to vector<1x8x1xf32>
    %43 = tpu.reciprocal %42 {approx = true} : vector<1x8x1xf32> -> vector<1x8x1xf32>
    %44 = vector.broadcast %43 : vector<1x8x1xf32> to vector<1x8x8xf32>
    %45 = arith.mulf %40, %44 : vector<1x8x8xf32>
    %46 = arith.truncf %45 : vector<1x8x8xf32> to vector<1x8x8xbf16>
    "tpu.trace_start"() <{level = 10 : i32, message = "bqk,bkd->bqd"}> : () -> ()
    %cst_25 = arith.constant dense<0.000000e+00> : vector<1x8x8xf32>
    %47 = tpu.matmul %46, %34, %cst_25 {dimension_numbers = #tpu.dot_dimension_numbers<[2], [1], [1], [2], [0, 0, 0, 1, 1, 2], [0], [0]>} : vector<1x8x8xbf16>, vector<1x8x8xbf16>, vector<1x8x8xf32> -> vector<1x8x8xf32>
    "tpu.trace_stop"() : () -> ()
    %48 = arith.truncf %47 : vector<1x8x8xf32> to vector<1x8x8xbf16>
    %49 = vector.shape_cast %48 : vector<1x8x8xbf16> to vector<8x8xbf16>
    %c0_26 = arith.constant 0 : index
    %c0_27 = arith.constant 0 : index
    %c0_28 = arith.constant 0 : index
    %c0_29 = arith.constant 0 : index
    %50 = vector.load %arg9[%c0_26, %c0_27, %c0_28, %c0_29] : memref<1x4x8x32xbf16, #tpu.memory_space<vmem>>, vector<1x1x8x32xbf16>
    %51 = vector.shape_cast %50 : vector<1x1x8x32xbf16> to vector<8x32xbf16>
    %cst_30 = arith.constant dense<0.000000e+00> : vector<8x32xf32>
    %52 = tpu.matmul %49, %51, %cst_30 {dimension_numbers = #tpu.dot_dimension_numbers<[1], [0], [0], [1], [0, 0, 1, 1], [], []>} : vector<8x8xbf16>, vector<8x32xbf16>, vector<8x32xf32> -> vector<8x32xf32>
    %53 = vector.extract_strided_slice %11 {offsets = [0, 8], sizes = [8, 8], strides = [1, 1]} : vector<8x32xf32> to vector<8x8xf32>
    %54 = vector.shape_cast %53 : vector<8x8xf32> to vector<1x8x8xf32>
    %55 = arith.truncf %54 : vector<1x8x8xf32> to vector<1x8x8xbf16>
    %56 = vector.extract_strided_slice %18 {offsets = [0, 8], sizes = [8, 8], strides = [1, 1]} : vector<8x32xf32> to vector<8x8xf32>
    %57 = vector.shape_cast %56 : vector<8x8xf32> to vector<1x8x8xf32>
    %58 = arith.truncf %57 : vector<1x8x8xf32> to vector<1x8x8xbf16>
    %59 = vector.extract_strided_slice %25 {offsets = [0, 8], sizes = [8, 8], strides = [1, 1]} : vector<8x32xf32> to vector<8x8xf32>
    %60 = vector.shape_cast %59 : vector<8x8xf32> to vector<1x8x8xf32>
    %61 = arith.truncf %60 : vector<1x8x8xf32> to vector<1x8x8xbf16>
    "tpu.trace_start"() <{level = 10 : i32, message = "bqd,bkd->bqk"}> : () -> ()
    %cst_31 = arith.constant dense<0.000000e+00> : vector<1x8x8xf32>
    %62 = tpu.matmul %55, %58, %cst_31 {dimension_numbers = #tpu.dot_dimension_numbers<[2], [2], [1], [1], [0, 0, 0, 1, 1, 1], [0], [0]>} : vector<1x8x8xbf16>, vector<1x8x8xbf16>, vector<1x8x8xf32> -> vector<1x8x8xf32>
    "tpu.trace_stop"() : () -> ()
    %cst_32 = arith.constant dense<0xFF800000> : vector<1x8xf32>
    %63 = vector.multi_reduction <maximumf>, %62, %cst_32 [2] : vector<1x8x8xf32> to vector<1x8xf32>
    %64 = vector.shape_cast %63 : vector<1x8xf32> to vector<1x8x1xf32>
    %65 = vector.broadcast %64 : vector<1x8x1xf32> to vector<1x8x8xf32>
    %66 = arith.subf %62, %65 : vector<1x8x8xf32>
    %67 = math.exp %66 : vector<1x8x8xf32>
    %cst_33 = arith.constant dense<0.000000e+00> : vector<1x8xf32>
    %68 = vector.multi_reduction <add>, %67, %cst_33 [2] : vector<1x8x8xf32> to vector<1x8xf32>
    %69 = vector.shape_cast %68 : vector<1x8xf32> to vector<1x8x1xf32>
    %70 = tpu.reciprocal %69 {approx = true} : vector<1x8x1xf32> -> vector<1x8x1xf32>
    %71 = vector.broadcast %70 : vector<1x8x1xf32> to vector<1x8x8xf32>
    %72 = arith.mulf %67, %71 : vector<1x8x8xf32>
    %73 = arith.truncf %72 : vector<1x8x8xf32> to vector<1x8x8xbf16>
    "tpu.trace_start"() <{level = 10 : i32, message = "bqk,bkd->bqd"}> : () -> ()
    %cst_34 = arith.constant dense<0.000000e+00> : vector<1x8x8xf32>
    %74 = tpu.matmul %73, %61, %cst_34 {dimension_numbers = #tpu.dot_dimension_numbers<[2], [1], [1], [2], [0, 0, 0, 1, 1, 2], [0], [0]>} : vector<1x8x8xbf16>, vector<1x8x8xbf16>, vector<1x8x8xf32> -> vector<1x8x8xf32>
    "tpu.trace_stop"() : () -> ()
    %75 = arith.truncf %74 : vector<1x8x8xf32> to vector<1x8x8xbf16>
    %76 = vector.shape_cast %75 : vector<1x8x8xbf16> to vector<8x8xbf16>
    %c0_35 = arith.constant 0 : index
    %c1 = arith.constant 1 : index
    %c0_36 = arith.constant 0 : index
    %c0_37 = arith.constant 0 : index
    %77 = vector.load %arg9[%c0_35, %c1, %c0_36, %c0_37] : memref<1x4x8x32xbf16, #tpu.memory_space<vmem>>, vector<1x1x8x32xbf16>
    %78 = vector.shape_cast %77 : vector<1x1x8x32xbf16> to vector<8x32xbf16>
    %cst_38 = arith.constant dense<0.000000e+00> : vector<8x32xf32>
    %79 = tpu.matmul %76, %78, %cst_38 {dimension_numbers = #tpu.dot_dimension_numbers<[1], [0], [0], [1], [0, 0, 1, 1], [], []>} : vector<8x8xbf16>, vector<8x32xbf16>, vector<8x32xf32> -> vector<8x32xf32>
    %80 = vector.extract_strided_slice %11 {offsets = [0, 16], sizes = [8, 8], strides = [1, 1]} : vector<8x32xf32> to vector<8x8xf32>
    %81 = vector.shape_cast %80 : vector<8x8xf32> to vector<1x8x8xf32>
    %82 = arith.truncf %81 : vector<1x8x8xf32> to vector<1x8x8xbf16>
    %83 = vector.extract_strided_slice %18 {offsets = [0, 16], sizes = [8, 8], strides = [1, 1]} : vector<8x32xf32> to vector<8x8xf32>
    %84 = vector.shape_cast %83 : vector<8x8xf32> to vector<1x8x8xf32>
    %85 = arith.truncf %84 : vector<1x8x8xf32> to vector<1x8x8xbf16>
    %86 = vector.extract_strided_slice %25 {offsets = [0, 16], sizes = [8, 8], strides = [1, 1]} : vector<8x32xf32> to vector<8x8xf32>
    %87 = vector.shape_cast %86 : vector<8x8xf32> to vector<1x8x8xf32>
    %88 = arith.truncf %87 : vector<1x8x8xf32> to vector<1x8x8xbf16>
    "tpu.trace_start"() <{level = 10 : i32, message = "bqd,bkd->bqk"}> : () -> ()
    %cst_39 = arith.constant dense<0.000000e+00> : vector<1x8x8xf32>
    %89 = tpu.matmul %82, %85, %cst_39 {dimension_numbers = #tpu.dot_dimension_numbers<[2], [2], [1], [1], [0, 0, 0, 1, 1, 1], [0], [0]>} : vector<1x8x8xbf16>, vector<1x8x8xbf16>, vector<1x8x8xf32> -> vector<1x8x8xf32>
    "tpu.trace_stop"() : () -> ()
    %cst_40 = arith.constant dense<0xFF800000> : vector<1x8xf32>
    %90 = vector.multi_reduction <maximumf>, %89, %cst_40 [2] : vector<1x8x8xf32> to vector<1x8xf32>
    %91 = vector.shape_cast %90 : vector<1x8xf32> to vector<1x8x1xf32>
    %92 = vector.broadcast %91 : vector<1x8x1xf32> to vector<1x8x8xf32>
    %93 = arith.subf %89, %92 : vector<1x8x8xf32>
    %94 = math.exp %93 : vector<1x8x8xf32>
    %cst_41 = arith.constant dense<0.000000e+00> : vector<1x8xf32>
    %95 = vector.multi_reduction <add>, %94, %cst_41 [2] : vector<1x8x8xf32> to vector<1x8xf32>
    %96 = vector.shape_cast %95 : vector<1x8xf32> to vector<1x8x1xf32>
    %97 = tpu.reciprocal %96 {approx = true} : vector<1x8x1xf32> -> vector<1x8x1xf32>
    %98 = vector.broadcast %97 : vector<1x8x1xf32> to vector<1x8x8xf32>
    %99 = arith.mulf %94, %98 : vector<1x8x8xf32>
    %100 = arith.truncf %99 : vector<1x8x8xf32> to vector<1x8x8xbf16>
    "tpu.trace_start"() <{level = 10 : i32, message = "bqk,bkd->bqd"}> : () -> ()
    %cst_42 = arith.constant dense<0.000000e+00> : vector<1x8x8xf32>
    %101 = tpu.matmul %100, %88, %cst_42 {dimension_numbers = #tpu.dot_dimension_numbers<[2], [1], [1], [2], [0, 0, 0, 1, 1, 2], [0], [0]>} : vector<1x8x8xbf16>, vector<1x8x8xbf16>, vector<1x8x8xf32> -> vector<1x8x8xf32>
    "tpu.trace_stop"() : () -> ()
    %102 = arith.truncf %101 : vector<1x8x8xf32> to vector<1x8x8xbf16>
    %103 = vector.shape_cast %102 : vector<1x8x8xbf16> to vector<8x8xbf16>
    %c0_43 = arith.constant 0 : index
    %c2 = arith.constant 2 : index
    %c0_44 = arith.constant 0 : index
    %c0_45 = arith.constant 0 : index
    %104 = vector.load %arg9[%c0_43, %c2, %c0_44, %c0_45] : memref<1x4x8x32xbf16, #tpu.memory_space<vmem>>, vector<1x1x8x32xbf16>
    %105 = vector.shape_cast %104 : vector<1x1x8x32xbf16> to vector<8x32xbf16>
    %cst_46 = arith.constant dense<0.000000e+00> : vector<8x32xf32>
    %106 = tpu.matmul %103, %105, %cst_46 {dimension_numbers = #tpu.dot_dimension_numbers<[1], [0], [0], [1], [0, 0, 1, 1], [], []>} : vector<8x8xbf16>, vector<8x32xbf16>, vector<8x32xf32> -> vector<8x32xf32>
    %107 = vector.extract_strided_slice %11 {offsets = [0, 24], sizes = [8, 8], strides = [1, 1]} : vector<8x32xf32> to vector<8x8xf32>
    %108 = vector.shape_cast %107 : vector<8x8xf32> to vector<1x8x8xf32>
    %109 = arith.truncf %108 : vector<1x8x8xf32> to vector<1x8x8xbf16>
    %110 = vector.extract_strided_slice %18 {offsets = [0, 24], sizes = [8, 8], strides = [1, 1]} : vector<8x32xf32> to vector<8x8xf32>
    %111 = vector.shape_cast %110 : vector<8x8xf32> to vector<1x8x8xf32>
    %112 = arith.truncf %111 : vector<1x8x8xf32> to vector<1x8x8xbf16>
    %113 = vector.extract_strided_slice %25 {offsets = [0, 24], sizes = [8, 8], strides = [1, 1]} : vector<8x32xf32> to vector<8x8xf32>
    %114 = vector.shape_cast %113 : vector<8x8xf32> to vector<1x8x8xf32>
    %115 = arith.truncf %114 : vector<1x8x8xf32> to vector<1x8x8xbf16>
    "tpu.trace_start"() <{level = 10 : i32, message = "bqd,bkd->bqk"}> : () -> ()
    %cst_47 = arith.constant dense<0.000000e+00> : vector<1x8x8xf32>
    %116 = tpu.matmul %109, %112, %cst_47 {dimension_numbers = #tpu.dot_dimension_numbers<[2], [2], [1], [1], [0, 0, 0, 1, 1, 1], [0], [0]>} : vector<1x8x8xbf16>, vector<1x8x8xbf16>, vector<1x8x8xf32> -> vector<1x8x8xf32>
    "tpu.trace_stop"() : () -> ()
    %cst_48 = arith.constant dense<0xFF800000> : vector<1x8xf32>
    %117 = vector.multi_reduction <maximumf>, %116, %cst_48 [2] : vector<1x8x8xf32> to vector<1x8xf32>
    %118 = vector.shape_cast %117 : vector<1x8xf32> to vector<1x8x1xf32>
    %119 = vector.broadcast %118 : vector<1x8x1xf32> to vector<1x8x8xf32>
    %120 = arith.subf %116, %119 : vector<1x8x8xf32>
    %121 = math.exp %120 : vector<1x8x8xf32>
    %cst_49 = arith.constant dense<0.000000e+00> : vector<1x8xf32>
    %122 = vector.multi_reduction <add>, %121, %cst_49 [2] : vector<1x8x8xf32> to vector<1x8xf32>
    %123 = vector.shape_cast %122 : vector<1x8xf32> to vector<1x8x1xf32>
    %124 = tpu.reciprocal %123 {approx = true} : vector<1x8x1xf32> -> vector<1x8x1xf32>
    %125 = vector.broadcast %124 : vector<1x8x1xf32> to vector<1x8x8xf32>
    %126 = arith.mulf %121, %125 : vector<1x8x8xf32>
    %127 = arith.truncf %126 : vector<1x8x8xf32> to vector<1x8x8xbf16>
    "tpu.trace_start"() <{level = 10 : i32, message = "bqk,bkd->bqd"}> : () -> ()
    %cst_50 = arith.constant dense<0.000000e+00> : vector<1x8x8xf32>
    %128 = tpu.matmul %127, %115, %cst_50 {dimension_numbers = #tpu.dot_dimension_numbers<[2], [1], [1], [2], [0, 0, 0, 1, 1, 2], [0], [0]>} : vector<1x8x8xbf16>, vector<1x8x8xbf16>, vector<1x8x8xf32> -> vector<1x8x8xf32>
    "tpu.trace_stop"() : () -> ()
    %129 = arith.truncf %128 : vector<1x8x8xf32> to vector<1x8x8xbf16>
    %130 = vector.shape_cast %129 : vector<1x8x8xbf16> to vector<8x8xbf16>
    %c0_51 = arith.constant 0 : index
    %c3 = arith.constant 3 : index
    %c0_52 = arith.constant 0 : index
    %c0_53 = arith.constant 0 : index
    %131 = vector.load %arg9[%c0_51, %c3, %c0_52, %c0_53] : memref<1x4x8x32xbf16, #tpu.memory_space<vmem>>, vector<1x1x8x32xbf16>
    %132 = vector.shape_cast %131 : vector<1x1x8x32xbf16> to vector<8x32xbf16>
    %cst_54 = arith.constant dense<0.000000e+00> : vector<8x32xf32>
    %133 = tpu.matmul %130, %132, %cst_54 {dimension_numbers = #tpu.dot_dimension_numbers<[1], [0], [0], [1], [0, 0, 1, 1], [], []>} : vector<8x8xbf16>, vector<8x32xbf16>, vector<8x32xf32> -> vector<8x32xf32>
    %cst_55 = arith.constant 0.000000e+00 : f32
    %134 = vector.broadcast %cst_55 : f32 to vector<8x32xf32>
    %135 = arith.addf %134, %52 : vector<8x32xf32>
    %136 = arith.addf %135, %79 : vector<8x32xf32>
    %137 = arith.addf %136, %106 : vector<8x32xf32>
    %138 = arith.addf %137, %133 : vector<8x32xf32>
    %c0_56 = arith.constant 0 : index
    %c0_57 = arith.constant 0 : index
    %c0_58 = arith.constant 0 : index
    %139 = vector.load %arg10[%c0_56, %c0_57, %c0_58] : memref<1x1x32xf32, #tpu.memory_space<vmem>>, vector<1x1x32xf32>
    %140 = vector.shape_cast %139 : vector<1x1x32xf32> to vector<1x32xf32>
    %141 = vector.broadcast %140 : vector<1x32xf32> to vector<8x32xf32>
    %142 = arith.addf %138, %141 : vector<8x32xf32>
    %143 = arith.addf %3, %142 : vector<8x32xf32>
    %c0_59 = arith.constant 0 : index
    %c0_60 = arith.constant 0 : index
    %c0_61 = arith.constant 0 : index
    %144 = vector.load %arg11[%c0_59, %c0_60, %c0_61] : memref<1x1x32xf32, #tpu.memory_space<vmem>>, vector<1x1x32xf32>
    %145 = vector.shape_cast %144 : vector<1x1x32xf32> to vector<1x32xf32>
    %c0_62 = arith.constant 0 : index
    %c0_63 = arith.constant 0 : index
    %c0_64 = arith.constant 0 : index
    %146 = vector.load %arg12[%c0_62, %c0_63, %c0_64] : memref<1x1x32xf32, #tpu.memory_space<vmem>>, vector<1x1x32xf32>
    %147 = vector.shape_cast %146 : vector<1x1x32xf32> to vector<1x32xf32>
    %cst_65 = arith.constant dense<0.000000e+00> : vector<8xf32>
    %148 = vector.multi_reduction <add>, %143, %cst_65 [1] : vector<8x32xf32> to vector<8xf32>
    %149 = vector.shape_cast %148 : vector<8xf32> to vector<8x1xf32>
    %cst_66 = arith.constant 3.200000e+01 : f32
    %150 = vector.broadcast %cst_66 : f32 to vector<8x1xf32>
    %151 = arith.divf %149, %150 : vector<8x1xf32>
    %152 = arith.mulf %143, %143 : vector<8x32xf32>
    %cst_67 = arith.constant dense<0.000000e+00> : vector<8xf32>
    %153 = vector.multi_reduction <add>, %152, %cst_67 [1] : vector<8x32xf32> to vector<8xf32>
    %154 = vector.shape_cast %153 : vector<8xf32> to vector<8x1xf32>
    %cst_68 = arith.constant 3.200000e+01 : f32
    %155 = vector.broadcast %cst_68 : f32 to vector<8x1xf32>
    %156 = arith.divf %154, %155 : vector<8x1xf32>
    %157 = arith.mulf %151, %151 : vector<8x1xf32>
    %158 = arith.subf %156, %157 : vector<8x1xf32>
    %159 = vector.broadcast %151 : vector<8x1xf32> to vector<8x32xf32>
    %160 = arith.subf %143, %159 : vector<8x32xf32>
    %cst_69 = arith.constant 9.99999974E-6 : f32
    %161 = vector.broadcast %cst_69 : f32 to vector<8x1xf32>
    %162 = arith.addf %158, %161 : vector<8x1xf32>
    %163 = math.rsqrt %162 : vector<8x1xf32>
    %164 = vector.broadcast %163 : vector<8x1xf32> to vector<8x32xf32>
    %165 = arith.mulf %160, %164 : vector<8x32xf32>
    %166 = vector.broadcast %145 : vector<1x32xf32> to vector<8x32xf32>
    %167 = arith.mulf %165, %166 : vector<8x32xf32>
    %168 = vector.broadcast %147 : vector<1x32xf32> to vector<8x32xf32>
    %169 = arith.addf %167, %168 : vector<8x32xf32>
    %170 = arith.truncf %169 : vector<8x32xf32> to vector<8x32xbf16>
    %c0_70 = arith.constant 0 : index
    %c0_71 = arith.constant 0 : index
    %c0_72 = arith.constant 0 : index
    %171 = vector.load %arg13[%c0_70, %c0_71, %c0_72] : memref<1x32x64xbf16, #tpu.memory_space<vmem>>, vector<1x32x64xbf16>
    %172 = vector.shape_cast %171 : vector<1x32x64xbf16> to vector<32x64xbf16>
    %cst_73 = arith.constant dense<0.000000e+00> : vector<8x64xf32>
    %173 = tpu.matmul %170, %172, %cst_73 {dimension_numbers = #tpu.dot_dimension_numbers<[1], [0], [0], [1], [0, 0, 1, 1], [], []>} : vector<8x32xbf16>, vector<32x64xbf16>, vector<8x64xf32> -> vector<8x64xf32>
    %c0_74 = arith.constant 0 : index
    %c0_75 = arith.constant 0 : index
    %c0_76 = arith.constant 0 : index
    %174 = vector.load %arg14[%c0_74, %c0_75, %c0_76] : memref<1x1x64xf32, #tpu.memory_space<vmem>>, vector<1x1x64xf32>
    %175 = vector.shape_cast %174 : vector<1x1x64xf32> to vector<1x64xf32>
    %176 = vector.broadcast %175 : vector<1x64xf32> to vector<8x64xf32>
    %177 = arith.addf %173, %176 : vector<8x64xf32>
    %cst_77 = arith.constant 0.000000e+00 : f32
    %178 = vector.broadcast %cst_77 : f32 to vector<8x64xf32>
    %179 = arith.maximumf %177, %178 : vector<8x64xf32>
    %180 = arith.truncf %179 : vector<8x64xf32> to vector<8x64xbf16>
    %c0_78 = arith.constant 0 : index
    %c0_79 = arith.constant 0 : index
    %c0_80 = arith.constant 0 : index
    %181 = vector.load %arg15[%c0_78, %c0_79, %c0_80] : memref<1x64x32xbf16, #tpu.memory_space<vmem>>, vector<1x64x32xbf16>
    %182 = vector.shape_cast %181 : vector<1x64x32xbf16> to vector<64x32xbf16>
    %cst_81 = arith.constant dense<0.000000e+00> : vector<8x32xf32>
    %183 = tpu.matmul %180, %182, %cst_81 {dimension_numbers = #tpu.dot_dimension_numbers<[1], [0], [0], [1], [0, 0, 1, 1], [], []>} : vector<8x64xbf16>, vector<64x32xbf16>, vector<8x32xf32> -> vector<8x32xf32>
    %c0_82 = arith.constant 0 : index
    %c0_83 = arith.constant 0 : index
    %c0_84 = arith.constant 0 : index
    %184 = vector.load %arg16[%c0_82, %c0_83, %c0_84] : memref<1x1x32xf32, #tpu.memory_space<vmem>>, vector<1x1x32xf32>
    %185 = vector.shape_cast %184 : vector<1x1x32xf32> to vector<1x32xf32>
    %186 = vector.broadcast %185 : vector<1x32xf32> to vector<8x32xf32>
    %187 = arith.addf %183, %186 : vector<8x32xf32>
    %188 = arith.addf %169, %187 : vector<8x32xf32>
    %c0_85 = arith.constant 0 : index
    %c0_86 = arith.constant 0 : index
    %c0_87 = arith.constant 0 : index
    %189 = vector.load %arg17[%c0_85, %c0_86, %c0_87] : memref<1x1x32xf32, #tpu.memory_space<vmem>>, vector<1x1x32xf32>
    %190 = vector.shape_cast %189 : vector<1x1x32xf32> to vector<1x32xf32>
    %c0_88 = arith.constant 0 : index
    %c0_89 = arith.constant 0 : index
    %c0_90 = arith.constant 0 : index
    %191 = vector.load %arg18[%c0_88, %c0_89, %c0_90] : memref<1x1x32xf32, #tpu.memory_space<vmem>>, vector<1x1x32xf32>
    %192 = vector.shape_cast %191 : vector<1x1x32xf32> to vector<1x32xf32>
    %cst_91 = arith.constant dense<0.000000e+00> : vector<8xf32>
    %193 = vector.multi_reduction <add>, %188, %cst_91 [1] : vector<8x32xf32> to vector<8xf32>
    %194 = vector.shape_cast %193 : vector<8xf32> to vector<8x1xf32>
    %cst_92 = arith.constant 3.200000e+01 : f32
    %195 = vector.broadcast %cst_92 : f32 to vector<8x1xf32>
    %196 = arith.divf %194, %195 : vector<8x1xf32>
    %197 = arith.mulf %188, %188 : vector<8x32xf32>
    %cst_93 = arith.constant dense<0.000000e+00> : vector<8xf32>
    %198 = vector.multi_reduction <add>, %197, %cst_93 [1] : vector<8x32xf32> to vector<8xf32>
    %199 = vector.shape_cast %198 : vector<8xf32> to vector<8x1xf32>
    %cst_94 = arith.constant 3.200000e+01 : f32
    %200 = vector.broadcast %cst_94 : f32 to vector<8x1xf32>
    %201 = arith.divf %199, %200 : vector<8x1xf32>
    %202 = arith.mulf %196, %196 : vector<8x1xf32>
    %203 = arith.subf %201, %202 : vector<8x1xf32>
    %204 = vector.broadcast %196 : vector<8x1xf32> to vector<8x32xf32>
    %205 = arith.subf %188, %204 : vector<8x32xf32>
    %cst_95 = arith.constant 9.99999974E-6 : f32
    %206 = vector.broadcast %cst_95 : f32 to vector<8x1xf32>
    %207 = arith.addf %203, %206 : vector<8x1xf32>
    %208 = math.rsqrt %207 : vector<8x1xf32>
    %209 = vector.broadcast %208 : vector<8x1xf32> to vector<8x32xf32>
    %210 = arith.mulf %205, %209 : vector<8x32xf32>
    %211 = vector.broadcast %190 : vector<1x32xf32> to vector<8x32xf32>
    %212 = arith.mulf %210, %211 : vector<8x32xf32>
    %213 = vector.broadcast %192 : vector<1x32xf32> to vector<8x32xf32>
    %214 = arith.addf %212, %213 : vector<8x32xf32>
    %c0_96 = arith.constant 0 : index
    %c0_97 = arith.constant 0 : index
    %215 = vector.load %arg20[%c0_96, %c0_97] : memref<8x32xf32, #tpu.memory_space<vmem>>, vector<8x32xf32>
    tpu.vector_store %arg20[%c0_96, %c0_97], %214 {strides = array<i32>} : memref<8x32xf32, #tpu.memory_space<vmem>>, vector<8x32xf32>,
    %c1_i32 = arith.constant 1 : i32
    %216 = arith.cmpi eq, %arg1, %c1_i32 : i32
    %217 = arith.extui %216 : i1 to i32
    %c0_i32_98 = arith.constant 0 : i32
    %218 = arith.cmpi ne, %217, %c0_i32_98 : i32
    scf.if %218 {
      %219 = vector.shape_cast %214 : vector<8x32xf32> to vector<1x8x32xf32>
      %c0_99 = arith.constant 0 : index
      %c0_100 = arith.constant 0 : index
      %c0_101 = arith.constant 0 : index
      %220 = vector.load %arg19[%c0_99, %c0_100, %c0_101] : memref<1x8x32xf32, #tpu.memory_space<vmem>>, vector<1x8x32xf32>
      tpu.vector_store %arg19[%c0_99, %c0_100, %c0_101], %219 {strides = array<i32>} : memref<1x8x32xf32, #tpu.memory_space<vmem>>, vector<1x8x32xf32>,
    } else {
    }
    return
  }
  func.func @transform_0(%arg0: i32, %arg1: i32) -> (i32, i32, i32) {
    %c0_i32 = arith.constant 0 : i32
    %c0_i32_0 = arith.constant 0 : i32
    %c0_i32_1 = arith.constant 0 : i32
    return %arg0, %c0_i32, %c0_i32_0 : i32, i32, i32
  }
  func.func @transform_1(%arg0: i32, %arg1: i32) -> (i32, i32, i32) {
    %c0_i32 = arith.constant 0 : i32
    %c0_i32_0 = arith.constant 0 : i32
    %c0_i32_1 = arith.constant 0 : i32
    return %arg1, %c0_i32, %c0_i32_0 : i32, i32, i32
  }
  func.func @transform_2(%arg0: i32, %arg1: i32) -> (i32, i32, i32) {
    %c0_i32 = arith.constant 0 : i32
    %c0_i32_0 = arith.constant 0 : i32
    %c0_i32_1 = arith.constant 0 : i32
    return %arg1, %c0_i32, %c0_i32_0 : i32, i32, i32
  }
  func.func @transform_3(%arg0: i32, %arg1: i32) -> (i32, i32, i32) {
    %c0_i32 = arith.constant 0 : i32
    %c0_i32_0 = arith.constant 0 : i32
    %c0_i32_1 = arith.constant 0 : i32
    return %arg1, %c0_i32, %c0_i32_0 : i32, i32, i32
  }
  func.func @transform_4(%arg0: i32, %arg1: i32) -> (i32, i32, i32) {
    %c0_i32 = arith.constant 0 : i32
    %c0_i32_0 = arith.constant 0 : i32
    %c0_i32_1 = arith.constant 0 : i32
    return %arg1, %c0_i32, %c0_i32_0 : i32, i32, i32
  }
  func.func @transform_5(%arg0: i32, %arg1: i32) -> (i32, i32, i32) {
    %c0_i32 = arith.constant 0 : i32
    %c0_i32_0 = arith.constant 0 : i32
    %c0_i32_1 = arith.constant 0 : i32
    return %arg1, %c0_i32, %c0_i32_0 : i32, i32, i32
  }
  func.func @transform_6(%arg0: i32, %arg1: i32) -> (i32, i32, i32) {
    %c0_i32 = arith.constant 0 : i32
    %c0_i32_0 = arith.constant 0 : i32
    %c0_i32_1 = arith.constant 0 : i32
    return %arg1, %c0_i32, %c0_i32_0 : i32, i32, i32
  }
  func.func @transform_7(%arg0: i32, %arg1: i32) -> (i32, i32, i32, i32) {
    %c0_i32 = arith.constant 0 : i32
    %c0_i32_0 = arith.constant 0 : i32
    %c0_i32_1 = arith.constant 0 : i32
    %c0_i32_2 = arith.constant 0 : i32
    return %arg1, %c0_i32, %c0_i32_0, %c0_i32_1 : i32, i32, i32, i32
  }
  func.func @transform_8(%arg0: i32, %arg1: i32) -> (i32, i32, i32) {
    %c0_i32 = arith.constant 0 : i32
    %c0_i32_0 = arith.constant 0 : i32
    %c0_i32_1 = arith.constant 0 : i32
    return %arg1, %c0_i32, %c0_i32_0 : i32, i32, i32
  }
  func.func @transform_9(%arg0: i32, %arg1: i32) -> (i32, i32, i32) {
    %c0_i32 = arith.constant 0 : i32
    %c0_i32_0 = arith.constant 0 : i32
    %c0_i32_1 = arith.constant 0 : i32
    return %arg1, %c0_i32, %c0_i32_0 : i32, i32, i32
  }
  func.func @transform_10(%arg0: i32, %arg1: i32) -> (i32, i32, i32) {
    %c0_i32 = arith.constant 0 : i32
    %c0_i32_0 = arith.constant 0 : i32
    %c0_i32_1 = arith.constant 0 : i32
    return %arg1, %c0_i32, %c0_i32_0 : i32, i32, i32
  }
  func.func @transform_11(%arg0: i32, %arg1: i32) -> (i32, i32, i32) {
    %c0_i32 = arith.constant 0 : i32
    %c0_i32_0 = arith.constant 0 : i32
    %c0_i32_1 = arith.constant 0 : i32
    return %arg1, %c0_i32, %c0_i32_0 : i32, i32, i32
  }
  func.func @transform_12(%arg0: i32, %arg1: i32) -> (i32, i32, i32) {
    %c0_i32 = arith.constant 0 : i32
    %c0_i32_0 = arith.constant 0 : i32
    %c0_i32_1 = arith.constant 0 : i32
    return %arg1, %c0_i32, %c0_i32_0 : i32, i32, i32
  }
  func.func @transform_13(%arg0: i32, %arg1: i32) -> (i32, i32, i32) {
    %c0_i32 = arith.constant 0 : i32
    %c0_i32_0 = arith.constant 0 : i32
    %c0_i32_1 = arith.constant 0 : i32
    return %arg1, %c0_i32, %c0_i32_0 : i32, i32, i32
  }
  func.func @transform_14(%arg0: i32, %arg1: i32) -> (i32, i32, i32) {
    %c0_i32 = arith.constant 0 : i32
    %c0_i32_0 = arith.constant 0 : i32
    %c0_i32_1 = arith.constant 0 : i32
    return %arg1, %c0_i32, %c0_i32_0 : i32, i32, i32
  }
  func.func @transform_15(%arg0: i32, %arg1: i32) -> (i32, i32, i32) {
    %c0_i32 = arith.constant 0 : i32
    %c0_i32_0 = arith.constant 0 : i32
    %c0_i32_1 = arith.constant 0 : i32
    return %arg1, %c0_i32, %c0_i32_0 : i32, i32, i32
  }
  func.func @transform_16(%arg0: i32, %arg1: i32) -> (i32, i32, i32) {
    %c0_i32 = arith.constant 0 : i32
    %c0_i32_0 = arith.constant 0 : i32
    %c0_i32_1 = arith.constant 0 : i32
    return %arg1, %c0_i32, %c0_i32_0 : i32, i32, i32
  }
  func.func @transform_17(%arg0: i32, %arg1: i32) -> (i32, i32, i32) {
    %c0_i32 = arith.constant 0 : i32
    %c0_i32_0 = arith.constant 0 : i32
    %c0_i32_1 = arith.constant 0 : i32
    return %arg0, %c0_i32, %c0_i32_0 : i32, i32, i32
  }
}

</mosaic_0001>

<bundles_post_ra>
// kernel: tpu_custom_call.1
= control target key start
LH: loop header
LB: loop body
LE: loop exit
PB: predicated region body
PF: predicated region fallthrough
CT: control target
= control target key end

     0   :  { %s3480_s0 = inlined_call_operand.hbm [shape: f32[2,8,32], index: 0, kind: input, shape index: {}]   ;;  %s3481_s1 = inlined_call_operand.vmem [shape: bf16[2,32,32], index: 1, kind: input, shape index: {}]   ;;  %s3482_s2 = inlined_call_operand.vmem [shape: bf16[2,32,32], index: 2, kind: input, shape index: {}]   ;;  %s3483_s3 = inlined_call_operand.vmem [shape: bf16[2,32,32], index: 3, kind: input, shape index: {}]   ;;  %s3484_s4 = inlined_call_operand.vmem [shape: f32[2,1,32], index: 4, kind: input, shape index: {}]   ;;  %s3485_s5 = inlined_call_operand.vmem [shape: f32[2,1,32], index: 5, kind: input, shape index: {}]   ;;  %s3486_s6 = inlined_call_operand.vmem [shape: f32[2,1,32], index: 6, kind: input, shape index: {}]   ;;  %s3487_s7 = inlined_call_operand.hbm [shape: bf16[2,4,8,32], index: 7, kind: input, shape index: {}]   ;;  %s3488_s8 = inlined_call_operand.vmem [shape: f32[2,1,32], index: 8, kind: input, shape index: {}]   ;;  %s3489_s9 = inlined_call_operand.vmem [shape: f32[2,1,32], index: 9, kind: input, shape index: {}]   ;;  %s3490_s10 = inlined_call_operand.vmem [shape: f32[2,1,32], index: 10, kind: input, shape index: {}]   ;;  %s3491_s11 = inlined_call_operand.hbm [shape: bf16[2,32,64], index: 11, kind: input, shape index: {}]   ;;  %s3492_s12 = inlined_call_operand.vmem [shape: f32[2,1,64], index: 12, kind: input, shape index: {}]   ;;  %s3493_s13 = inlined_call_operand.vmem [shape: bf16[2,64,32], index: 13, kind: input, shape index: {}]   ;;  %s3494_s14 = inlined_call_operand.vmem [shape: f32[2,1,32], index: 14, kind: input, shape index: {}]   ;;  %s3495_s15 = inlined_call_operand.vmem [shape: f32[2,1,32], index: 15, kind: input, shape index: {}]   ;;  %s3496_s16 = inlined_call_operand.vmem [shape: f32[2,1,32], index: 16, kind: input, shape index: {}]   ;;  %s3497_s17 = inlined_call_operand.hbm [shape: f32[2,8,32], index: 17, kind: output, shape index: {}]  }
   0x1   :  { %3520 = sst [smem:[#allocation29_spill]] %s3480_s0 }
   0x2   :  { %3521 = sst [smem:[#allocation30_spill]] %s3481_s1 }
   0x3   :  { %3522 = sst [smem:[#allocation31_spill]] %s3482_s2 }
   0x4   :  { %3523 = sst [smem:[#allocation32_spill]] %s3483_s3 }
   0x5   :  { %3524 = sst [smem:[#allocation33_spill]] %s3485_s5 }
   0x6   :  { %3525 = sst [smem:[#allocation34_spill]] %s3486_s6 }
   0x7   :  { %3526 = sst [smem:[#allocation35_spill]] %s3487_s7 }
   0x8   :  { %3527 = sst [smem:[#allocation36_spill]] %s3488_s8 }
   0x9   :  { %3528 = sst [smem:[#allocation37_spill]] %s3489_s9 }
   0xa   :  { %3529 = sst [smem:[#allocation38_spill]] %s3490_s10 }
   0xb   :  { %3530 = sst [smem:[#allocation39_spill]] %s3491_s11 }
   0xc   :  { %3531 = sst [smem:[#allocation40_spill]] %s3492_s12 }
   0xd   :  { %3532 = sst [smem:[#allocation41_spill]] %s3493_s13 }
   0xe   :  { %3533 = sst [smem:[#allocation42_spill]] %s3494_s14 }
   0xf   :  { %3534 = sst [smem:[#allocation43_spill]] %s3495_s15 }
  0x10   :  { %3535 = sst [smem:[#allocation44_spill]] %s3496_s16 }
  0x11   :  { %3536 = sst [smem:[#allocation45_spill]] %s3497_s17 }
  0x12   :  { %22 = vsyncpa [#allocation4], 0 }
  0x13   :  { %24 = vsyncpa [#allocation4 + $0x1], 0 }
  0x14   :  { %25 = vsyncpa [#allocation7], 0 }
  0x15   :  { %27 = vsyncpa [#allocation7 + $0x1], 0 }
  0x16   :  { %28 = vsyncpa [#allocation5], 0 }
  0x17   :  { %30 = vsyncpa [#allocation5 + $0x1], 0  ;;  %s2920_s24 = smov 0   ;;  %s2922_s25 = smov 0  }
  0x18   :  { %s2924_s26 = smov 0   ;;  %s2926_s27 = smov 0  }
  0x19   :  { %s2928_s28 = smov 0   ;;  %s2930_s29 = smov 0  }
  0x1a   :  { %s2932_s0 = smov 0   ;;  %s2934_s30 = smov 0  }
  0x1b   :  { %s2936_s18 = smov 0   ;;  %s2938_s19 = smov 0  }
  0x1c   :  { %s2940_s1 = smov 0  }
  0x1d LB: > { %3537 = sst [smem:[#allocation13_spill]] %s2781_s25  ;;  %s45_s20 = sadd.s32 1, %s2809_s18  ;;  %s2817_s1 = sphi %s2940_s1, %s36_s1   ;;  %s2813_s19 = sphi %s2938_s19, %s3615_s19   ;;  %s2809_s18 = sphi %s2936_s18, %s3614_s18   ;;  %s2805_s30 = sphi %s2934_s30, %s3613_s30   ;;  %s2801_s0 = sphi %s2932_s0, %s3612_s0   ;;  %s2797_s29 = sphi %s2930_s29, %s3611_s29   ;;  %s2793_s28 = sphi %s2928_s28, %s3610_s28   ;;  %s2789_s27 = sphi %s2926_s27, %s3609_s27   ;;  %s2785_s26 = sphi %s2924_s26, %s3608_s26   ;;  %s2781_s25 = sphi %s2922_s25, %s3607_s25   ;;  %s2777_s24 = sphi %s2920_s24, %s3606_s24  }
  0x1e   : > { %3538 = sst [smem:[#allocation14_spill]] %s2785_s26  ;;  %p63_p0 = scmp.eq.s32.totalorder %s2817_s1, 0 }
  0x1f   : > { %3539 = sst [smem:[#allocation15_spill]] %s2789_s27  ;;  %p2977_p1 = scmp.ge.s32.totalorder %s45_s20, 2 }
  0x20   : > { %3540 = sst [smem:[#allocation16_spill]] %s2793_s28  ;;  %s237_s22 = sadd.s32 1, %s2785_s26 }
  0x21   : > { %3541 = sst [smem:[#allocation17_spill]] %s2797_s29  ;;  %p244_p2 = scmp.ne.s32.totalorder %s2785_s26, %s2781_s25 }
  0x22   : > { %3542 = sst [smem:[#allocation18_spill]] %s2805_s30  ;;  %s3617_s20 = smov (%p2977_p1, %s45_s20), 0 }
  0x23   : > { %3543 = sst [smem:[#allocation19_spill]] %s2809_s18  ;;  %p246_p3 = por %p244_p2, %p63_p0 }
  0x24   : > { %3544 = sst [smem:[#allocation20_spill]] %s2813_s19  ;;  %s234_s23 = ssub.s32 %s2809_s18, %s3617_s20 }
  0x25   : > { %3545 = sst [smem:[#allocation21_spill]] %s2817_s1  ;;  %p3501_p4 = scmp.lt.s32.totalorder %s2817_s1, 4 }
  0x26   : > { %3547 = sst [smem:[#allocation22_spill]] %s3617_s20  ;;  %p235_p5 = scmp.eq.s32.totalorder %s234_s23, 0 }
  0x27   : > { %s594_s17 = sand.u32 1, %s2817_s1   ;;  %s596_s30 = sand.u32 1, %s2785_s26  }
  0x28   : > { %s2996_s16 = scalar_select %p235_p5, %s2785_s26, %s237_s22  }
  0x29   : > { %s2998_s15 = sshll.u32 %s596_s30, 4  ;;  %s2295_s14 = sshll.u32 %s2809_s18, 8 }
  0x2a   : > { %3548 = sst [smem:[#allocation23_spill]] %s2996_s16  ;;  %s598_s9 = scalar_lea.vmem [#allocation6], %s2998_s15 }
  0x2b   : > { %s3549_s7 = sld [smem:[#allocation35_spill]]  ;;  %s605_s8 = sshll.u32 %s598_s9, 4  ;;  %s606_s8 = int_to_ptr.vmem [resolvable:$true] %s605_s8 }
  0x2c   : > { %p3007_p6 = pnand %p3501_p4, %p246_p3  ;;  %s3011_s22 = scalar_lea.sflag [#allocation7], %s594_s17 }
  0x2d   : > { %s2622_s30 = scalar_lea.vmem %s606_s8, 256  ;;  %s2819_s12 = smov [#allocation6]  }
  0x2e   : > { %p3500_p7 = pneg %p3007_p6  ;;  %p2623_p8 = scmp.ne.s32.totalorder %s606_s8, %s2622_s30 }
  0x2f   : > { %s2627_s9 = sshll.u32 %s2819_s12, 4  ;;  %s2628_s9 = int_to_ptr.vmem [resolvable:$false] %s2627_s9 }
  0x30   : > { %p2625_p9 = pnand %p2623_p8, %p3500_p7  ;;  %s2629_s13 = scalar_lea.vmem %s2628_s9, 512 }
  0x31   : > { %s604_s10 = scalar_lea.hbm %s3549_s7, %s2295_s14  ;;  %p2630_p11 = scmp.lt.s32.totalorder %s606_s8, %s2628_s9 }
  0x32   : > { %p2626_p10 = pneg %p2625_p9  ;;  %p2631_p12 = scmp.lt.s32.totalorder %s2629_s13, %s2622_s30 }
  0x34   : > { %p2632_p13 = por %p2631_p12, %p2630_p11 }
  0x36   : > { %p2633_p2 = pnand %p2632_p13, %p2626_p10 }
  0x38   : > { %2636 = shalt.err (!%p2633_p2)
}
  0x39   : > { %s3502_s23 = smov 64   ;;  %s3503_s17 = smov 4  }
  0x3a   : > { %2472 = dma.hbm_to_vmem [thread:$0]  (!%p3007_p6), %s604_s10, 256, %s606_s8, %s3011_s22, %s3502_s23, %s3502_s23, %s3503_s17  }
  0x3b   : > { %p250_p3 = scmp.ne.s32.totalorder %s2781_s25, %s2777_s24  ;;  %s3551_s11 = sld [smem:[#allocation39_spill]] }
  0x3c   : > { %p2234_p5 = scmp.ge.s32.totalorder %s2817_s1, 1  ;;  %s637_s13 = scalar_lea.vmem [#allocation8], %s2998_s15 }
  0x3d   : > { %s644_s7 = sshll.u32 %s637_s13, 4  ;;  %p684_p8 = scmp.lt.s32.totalorder %s2817_s1, 5  ;;  %s3104_s7 = int_to_ptr.vmem [resolvable:$true] %s644_s7 }
  0x3e   : > { %s3039_s8 = sadd.s32 4294967295, %s2817_s1   ;;  %s2223_s10 = sadd.s32 4294967294, %s2817_s1  }
  0x3f   : > { %p3034_p9 = pnand %p2234_p5, %p684_p8  ;;  %s55_s15 = sadd.s32 1, %s2797_s29 }
  0x40   : > { %p62_p10 = scmp.ne.s32.totalorder %s2797_s29, %s2793_s28  ;;  %p68_p12 = scmp.ne.s32.totalorder %s2793_s28, %s2789_s27 }
  0x41   : > { %s3029_s9 = scalar_lea.hbm %s3551_s11, %s2295_s14  ;;  %s48_s14 = sadd.s32 1, %s2813_s19 }
  0x42   : > { %s3619_s14 = smov (!%p2977_p1, %s48_s14), %s2813_s19  ;;  %p3053_p13 = por %p63_p0, %p62_p10 }
  0x43   : > { %p50_p11 = scmp.ge.s32.totalorder %s3619_s14, 2  ;;  %p69_p2 = scmp.eq.s32.totalorder %s3039_s8, 0 }
  0x44   : > { %p508_p0 = scmp.eq.s32.totalorder %s3039_s8, 3  ;;  %p514_p7 = scmp.eq.s32.totalorder %s2223_s10, 3 }
  0x45   : > { %s3621_s14 = smov (%p50_p11, %s3619_s14), 0  ;;  %p3063_p1 = por %p69_p2, %p68_p12 }
  0x46   : > { %3554 = sst [smem:[#allocation24_spill]] %s3621_s14  ;;  %p3070_p5 = por %p250_p3, %p69_p2 }
  0x47   : > { %s52_s13 = ssub.s32 %s2813_s19, %s3621_s14  ;;  %p3077_p4 = por %p508_p0, %p62_p10 }
  0x48   : > { %p53_p8 = scmp.eq.s32.totalorder %s52_s13, 0  ;;  %s534_s17 = sand.u32 1, %s2797_s29  }
  0x49   : > { %s3557_s23 = scalar_select %p3077_p4, 1, 0 }
  0x4a   : > { %s3083_s11 = scalar_select %p53_p8, %s2797_s29, %s55_s15  }
  0x4b   : > { %3558 = sst [smem:[#allocation25_spill]] %s3557_s23  ;;  %p3088_p11 = por %p514_p7, %p68_p12 }
  0x4c   : > { %3559 = sst [smem:[#allocation26_spill]] %s3083_s11  ;;  %s2226_s24 = sshll.u32 %s534_s17, 3 }
  0x4d   : > { %s3560_s18 = scalar_select %p3088_p11, 1, 0 }
  0x4e   : > { %s2227_s16 = sshll.u32 %s2813_s19, 7  ;;  %s3562_s14 = sld [smem:[#allocation29_spill]] }
  0x4f   : > { %3561 = sst [smem:[#allocation27_spill]] %s3560_s18  ;;  %s538_s13 = scalar_lea.vmem [#allocation3], %s2226_s24 }
  0x50   : > { %s545_s10 = sshll.u32 %s538_s13, 4  ;;  %p3563_p3 = scmp.lt.s32.totalorder %s2817_s1, 4  ;;  %s546_s10 = int_to_ptr.vmem [resolvable:$true] %s545_s10 }
  0x51   : > { %s535_s15 = scalar_lea.sflag [#allocation4], %s534_s17  ;;  %s2650_s19 = scalar_lea.vmem %s546_s10, 128 }
  0x52   : > { %p3100_p10 = pnand %p3563_p3, %p3053_p13  ;;  %p2651_p12 = scmp.ne.s32.totalorder %s546_s10, %s2650_s19 }
  0x53   : > { %s2822_s5 = smov [#allocation3]  }
  0x54   : > { %s543_s3 = scalar_lea.hbm %s3562_s14, %s2227_s16  ;;  %p2639_p7 = pneg %p3100_p10 }
  0x55   : > { %s2655_s16 = sshll.u32 %s2822_s5, 4  ;;  %s2656_s16 = int_to_ptr.vmem [resolvable:$false] %s2655_s16 }
  0x56   : > { %p2653_p2 = pnand %p2651_p12, %p2639_p7  ;;  %s2657_s26 = scalar_lea.vmem %s2656_s16, 256 }
  0x57   : > { %p2658_p8 = scmp.lt.s32.totalorder %s546_s10, %s2656_s16  ;;  %p2659_p13 = scmp.lt.s32.totalorder %s2657_s26, %s2650_s19 }
  0x58   : > { %p2654_p0 = pneg %p2653_p2 }
  0x59   : > { %p2660_p3 = por %p2659_p13, %p2658_p8 }
  0x5b   : > { %p2661_p11 = pnand %p2660_p3, %p2654_p0 }
  0x5d   : > { %2664 = shalt.err (!%p2661_p11)
}
  0x5e   : > { %2469 = dma.hbm_to_vmem [thread:$0]  (!%p3100_p10), %s543_s3, 128, %s546_s10, %s535_s15  }
  0x5f   : > { %s2678_s17 = scalar_lea.vmem %s3104_s7, 256  ;;  %p3565_p7 = pneg %p3007_p6 }
  0x60   : > { %p2679_p4 = scmp.ne.s32.totalorder %s3104_s7, %s2678_s17  ;;  %s2823_s14 = smov [#allocation8]  }
  0x61   : > { %s2683_s30 = sshll.u32 %s2823_s14, 4  ;;  %s2684_s30 = int_to_ptr.vmem [resolvable:$false] %s2683_s30 }
  0x62   : > { %p2681_p12 = pnand %p2679_p4, %p3565_p7  ;;  %s2685_s19 = scalar_lea.vmem %s2684_s30, 512 }
  0x63   : > { %p2686_p8 = scmp.lt.s32.totalorder %s3104_s7, %s2684_s30  ;;  %p2687_p0 = scmp.lt.s32.totalorder %s2685_s19, %s2678_s17 }
  0x64   : > { %p2682_p2 = pneg %p2681_p12 }
  0x65   : > { %p2688_p11 = por %p2687_p0, %p2686_p8 }
  0x67   : > { %p2689_p13 = pnand %p2688_p11, %p2682_p2 }
  0x69   : > { %2692 = shalt.err (!%p2689_p13)
}
  0x6a   : > { %s3566_s23 = smov 4   ;;  %s3567_s24 = smov 64  }
  0x6b   : > { %2475 = dma.hbm_to_vmem [thread:$0]  (!%p3007_p6), %s3029_s9, 256, %s3104_s7, %s3011_s22, %s3567_s24, %s3567_s24, %s3566_s23  }
  0x6c   : > { %688 = sbr.rel (%p3034_p9) target bundleno = 3173 (0xc65), region = 88 }
  0x71   : > { %s3127_s3 = sand.u32 1, %s2793_s28  }
  0x72   : > { %s3511_s13 = sshll.u32 %s3127_s3, 3  ;;  %s691_s10 = scalar_lea.sflag [#allocation4], %s3127_s3 }
  0x73   : > { %s3133_s6 = scalar_lea.vmem [#allocation3], %s3511_s13 }
  0x74   : > { %2764 = dma.done.wait (%p3063_p1), %s691_s10, 128  }
  0x75   : > { %2766 = vsyncadd (%p3063_p1), %s691_s10, 4294967168  ;;  %s699_s7 = sand.u32 1, %s3039_s8   ;;  %s701_s20 = sand.u32 1, %s2781_s25  }
  0x76   : > { %s3141_s22 = sshll.u32 %s701_s20, 4  ;;  %s700_s9 = scalar_lea.sflag [#allocation7], %s699_s7 }
  0x77   : > { %s3144_s15 = scalar_lea.vmem [#allocation6], %s3141_s22 }
  0x78   : > { %3568 = sst [smem:[#allocation28_spill]] %s3144_s15 }
  0x79   : > { %2768 = dma.done.wait (%p3070_p5), %s700_s9, 512  }
  0x7a   : > { %2770 = vsyncadd (%p3070_p5), %s700_s9, 4294966784  ;;  %p823_p4 = scmp.lt.s32.totalorder %s2801_s0, 1  ;;  %s3569_s14 = sld [smem:[#allocation30_spill]] }
  0x7b   : > { %s3570_s2 = sld [smem:[#allocation31_spill]]  ;;  %s712_s15 = scalar_lea.vmem [#allocation8], %s3141_s22 }
  0x7c   : > { %s3152_s21 = scalar_select %p823_p4, %s2801_s0, 1 }
  0x7d   : > { %s3571_s20 = sld [smem:[#allocation32_spill]]  ;;  %p2247_p6 = scmp.ne.s32.totalorder %s2801_s0, 0 }
  0x7e   : > { %s2297_s8 = sshll.u32 %s3152_s21, 4  ;;  %s3573_s28 = sld [smem:[#allocation34_spill]] }
  0x7f   : > { %s3577_s11 = sld [smem:[#allocation40_spill]]  ;;  %s2300_s12 = sshll.u32 %s3152_s21, 5 }
  0x80   : > { %s827_s30 = scalar_lea.vmem %s3569_s14, %s2297_s8  ;;  %s3579_s14 = sld [smem:[#allocation42_spill]] }
  0x81   : > { %s3165_s24 = scalar_lea.vmem %s3570_s2, %s2297_s8  ;;  %s3580_s23 = sld [smem:[#allocation43_spill]] }
  0x83   : > { %s3170_s9 = scalar_lea.vmem %s3571_s20, %s2297_s8  ;;  %s3581_s8 = sld [smem:[#allocation44_spill]] }
  0x84   : > { %s846_s26 = scalar_lea.vmem %s3573_s28, %s3152_s21  ;;  %s3578_s28 = sld [smem:[#allocation41_spill]] }
  0x85   : > { %s858_s13 = scalar_lea.vmem %s3577_s11, %s3152_s21  ;;  %s3582_s20 = sshll.u32 %s3127_s3, 3 }
  0x86   : > { %s866_s18 = scalar_lea.vmem %s3579_s14, %s3152_s21  ;;  %s3217_s11 = scalar_lea.vmem [#allocation9], %s3582_s20 }
  0x87   : > { %s869_s27 = scalar_lea.vmem %s3580_s23, %s3152_s21  ;;  %877 = sbr.rel (%p2247_p6) target bundleno = 142 (0x8e), region = 104 }
  0x89   : > { %s872_s7 = scalar_lea.vmem %s3581_s8, %s3152_s21 }
  0x8a   : > { %s3200_s16 = scalar_lea.vmem %s3578_s28, %s2300_s12 }
  0x8c   : > { %v878_v0 = vld [vmem:[%s3133_s6] sm:$0xff]  ;;  %vm879_vm0 = vcmask 261120  }
  0x8d   : > { %880 = vst.msk [vmem:[#allocation2] sm:$0xff] %vm879_vm0, %v878_v0 }
  0x8e PF: > { %v2577_v1 = vld [vmem:[%s827_s30 + $0x8] sm:$0xff]   ;;  %v2824_v2 = vmov 0.0   ;;  %v2578_v3 = vld [vmem:[%s827_s30] sm:$0xff]   ;;  %vm2825_vm1 = vmmov 0   ;;  %vm906_vm2 = vcmask 261120   ;;  %s3585_s28 = scalar_lea.vmem %s3484_s4, %s3152_s21  ;;  %vm1079_vm3 = vcmask 64512  }
  0x8f   : > { %2342 = vmatprep.subr.bf16.mxu1 %v2824_v2  ;;  %2358 = vmatprep.subr.bf16.mxu0 %v2824_v2  ;;  %v2579_v5 = vld [vmem:[%s3165_s24 + $0x8] sm:$0xff]   ;;  %v2580_v7 = vld [vmem:[%s3165_s24] sm:$0xff]   ;;  %s3583_s24 = sld [smem:[#allocation33_spill]]  ;;  %s2826_s17 = smov 120   ;;  %vm1141_vm4 = vcmask 1043456   ;;  %vm1864_vm5 = vcmask 523264  }
  0x90   : > { %2343 = vmatpush3.bf16.msra.mxu1 %v2577_v1  ;;  %2346 = vmatprep.mubr.msk.bf16.mxu1 %vm2825_vm1, %v2824_v2  ;;  %v2248_v13 = vld [vmem:[%s3585_s28] ss:$0 sm:$0xff]  ;;  %v2581_v23 = vld [vmem:[%s3170_s9 + $0x8] sm:$0xff]   ;;  %s3587_s19 = sld [smem:[#allocation28_spill]]  ;;  %s2828_s2 = smov 104  }
  0x91   : > { %2344 = vmatprep.subr.bf16.mxu1 %v2824_v2  ;;  %2362 = vmatprep.mubr.msk.bf16.mxu0 %vm2825_vm1, %v2824_v2  ;;  %v2582_v24 = vld [vmem:[%s3170_s9] sm:$0xff]   ;;  %s3588_s10 = sld [smem:[#allocation36_spill]]  ;;  %p2290_p9 = scmp.ne.s32.totalorder %s2801_s0, 1 }
  0x92   : > { %2359 = vmatpush3.bf16.msra.mxu0 %v2581_v23  ;;  %v2256_v33 = vld [vmem:[%s846_s26] ss:$0 sm:$0xff]  ;;  %s2827_s26 = smov 112   ;;  %s3590_s20 = sld [smem:[#allocation37_spill]] }
  0x93   : > { %2360 = vmatprep.subr.bf16.mxu0 %v2824_v2 }
  0x94   : > { %v3225_v4 = vld [vmem:[#allocation2] sm:$0xff]  ;;  %2345 = vmatpush3.bf16.msra.mxu1 %v2578_v3 }
  0x95   : > { %v882_v6 = vpack.c.bf16 %v3225_v4, %v3225_v4  ;;  %2350 = vmatprep.subr.bf16.mxu1 %v2824_v2  ;;  %s3584_s5 = scalar_lea.vmem %s3583_s24, %s3152_s21 }
  0x96   : > { %v2252_v12 = vld [vmem:[%s3584_s5] ss:$0 sm:$0xff]  ;;  %2361 = vmatpush3.bf16.msra.mxu0 %v2582_v24  ;;  %v2264_v62 = vld [vmem:[%s3587_s19 + $0x4] sm:$0xf]  ;;  %s3592_s5 = sld [smem:[#allocation38_spill]] }
  0x97   : > { %2347 = vmatmul.mubr.msk.bf16.vlgmr.msra.gmra.mxu1 %vm906_vm2, %v882_v6  ;;  %2372 = vmatprep.subr.bf16.mxu0 %v2824_v2  ;;  %v1307_v63 = vsel %vm1141_vm4, %v2264_v62, 0  ;;  %s3589_s8 = scalar_lea.vmem %s3588_s10, %s3152_s21 }
  0x98   : > { %2351 = vmatpush3.bf16.msra.mxu1 %v2579_v5  ;;  %2354 = vmatprep.mubr.msk.bf16.mxu1 %vm2825_vm1, %v2824_v2  ;;  %s3591_s6 = scalar_lea.vmem %s3590_s20, %s3152_s21 }
  0x99   : > { %2352 = vmatprep.subr.bf16.mxu1 %v2824_v2  ;;  %2363 = vmatmul.mubr.msk.bf16.vlgmr.msra.gmra.mxu0 %vm906_vm2, %v882_v6 }
  0x9a   : > { %2374 = vmatprep.mubr.msk.bf16.mxu0 %vm2825_vm1, %v2824_v2 }
  0x9c   : > { %2353 = vmatpush3.bf16.msra.mxu1 %v2580_v7  ;;  %s3593_s12 = scalar_lea.vmem %s3592_s5, %s3152_s21 }
  0x9d   : > { %2366 = vmatprep.subr.bf16.mxu1 %v2824_v2 }
  0x9f   : > { %2355 = vmatmul.mubr.msk.bf16.vlgmr.msra.gmra.mxu1 %vm906_vm2, %v882_v6 }
  0xa0   : > { %2368 = vmatprep.mubr.msk.bf16.mxu1 %vm2825_vm1, %v2824_v2 }
 0x157   : > { %v944_v8 = vpop.f32.mrf.mxu1 }
 0x158   : > { %v945_v17 = vadd.f32 %v2248_v13, %v944_v8 }
 0x159   : > { %v2348_v9 = vpop.f32.mrf.mxu1  ;;  %v1070_v34 = vpop.f32.mrf.mxu0 }
 0x15a   : > { %v3259_v22 = vpack.c.bf16 %v945_v17, %v945_v17  ;;  %v1071_v35 = vadd.f32 %v2256_v33, %v1070_v34 }
 0x15b   : > { %v947_v10 = vpop.f32.mrf.mxu1  ;;  %v2364_v36 = vpop.f32.mrf.mxu0 }
 0x15c   : > { %v3286_v37 = vpack.c.bf16 %v1071_v35, %v1071_v35 }
 0x15d   : > { %v2349_v11 = vpop.f32.mrf.mxu1  ;;  %v1073_v38 = vpop.f32.mrf.mxu0 }
 0x15e   : > { %v1143_v39 = vsel %vm1141_vm4, %v3286_v37, 0 }
 0x15f   : > { %v1007_v14 = vpop.f32.mrf.mxu1  ;;  %v2365_v40 = vpop.f32.mrf.mxu0  ;;  %2373 = vmatpush3.bf16.msra.mxu0 %v1143_v39 }
 0x160   : > { %v1008_v15 = vadd.f32 %v2252_v12, %v1007_v14  ;;  %2384 = vmatprep.subr.bf16.mxu0 %v2824_v2 }
 0x161   : > { %v2356_v16 = vpop.f32.mrf.mxu1 }
 0x162   : > { %v3253_v18 = vpack.c.bf16 %v1008_v15, %v1008_v15 }
 0x163   : > { %v1010_v19 = vpop.f32.mrf.mxu1 }
 0x164   : > { %1191 = vrot.lane.b32.xlu0 %v3253_v18, %s2826_s17  ;;  %v1084_v20 = vsel %vm1079_vm3, %v3253_v18, 0 }
 0x165   : > { %v2357_v21 = vpop.f32.mrf.mxu1  ;;  %2367 = vmatpush3.bf16.xpose.msra.mxu1 %v1084_v20 }
 0x166   : > { %2378 = vmatprep.subr.bf16.mxu1 %v2824_v2 }
 0x168   : > { %1188 = vrot.lane.b32.xlu0 %v3259_v22, %s2826_s17 }
 0x16c   : > { %2369 = vmatmul.mubr.msk.bf16.vlgmr.msra.gmra.mxu1 %vm1079_vm3, %v3259_v22 }
 0x16d   : > { %2380 = vmatprep.mubr.msk.bf16.mxu1 %vm2825_vm1, %v2824_v2 }
 0x1d6   : > { %v1192_v25 = vpop.permute.xlu0 %1191 }
 0x1d7   : > { %v1197_v26 = vsel %vm1079_vm3, %v1192_v25, 0 }
 0x1d8   : > { %2379 = vmatpush3.bf16.xpose.msra.mxu1 %v1197_v26 }
 0x1d9   : > { %2390 = vmatprep.subr.bf16.mxu1 %v2824_v2 }
 0x1da   : > { %v1189_v27 = vpop.permute.xlu0 %1188 }
 0x1df   : > { %2381 = vmatmul.mubr.msk.bf16.vlgmr.msra.gmra.mxu1 %vm1079_vm3, %v1189_v27 }
 0x1e0   : > { %2392 = vmatprep.mubr.msk.bf16.mxu1 %vm2825_vm1, %v2824_v2  ;;  %2391 = vmatpush3.bf16.msra.mxu1 %v1307_v63  ;;  %v2272_v63 = vld [vmem:[%s3587_s19 + $0xc] sm:$0xf] }
 0x1e1   : > { %2402 = vmatprep.subr.bf16.mxu1 %v2824_v2 }
 0x22c   : > { %v1120_v28 = vpop.f32.mrf.mxu1 }
 0x22d   : > { %v1126_v29 = vsel %vm1079_vm3, %v1120_v28, -inf }
 0x22e   : > { %1127 = vmax.xlane.f32.xlu1 %v1126_v29  ;;  %v2370_v30 = vpop.f32.mrf.mxu1 }
 0x230   : > { %v1123_v31 = vpop.f32.mrf.mxu1 }
 0x232   : > { %v2371_v32 = vpop.f32.mrf.mxu1 }
 0x29f   : > { %v1233_v41 = vpop.f32.mrf.mxu1 }
 0x2a0   : > { %v1239_v42 = vsel %vm1079_vm3, %v1233_v41, -inf }
 0x2a1   : > { %1240 = vmax.xlane.f32.xlu1 %v1239_v42  ;;  %v2382_v43 = vpop.f32.mrf.mxu1 }
 0x2a3   : > { %v1236_v44 = vpop.f32.mrf.mxu1 }
 0x2a5   : > { %v2383_v45 = vpop.f32.mrf.mxu1 }
 0x2b2   : > { %1252 = vrot.lane.b32.xlu1 %v3286_v37, %s2826_s17 }
 0x2b7   : > { %v1128_v46 = vpop.xlane.xlu1 %1127 }
 0x2b8   : > { %v1129_v47 = vsub.f32 %v1120_v28, %v1128_v46 }
 0x2ba   : > { %v1130_v48 = vmul.f32 1.442695, %v1129_v47 }
 0x2bc   : > { %2589 = vpow2.f32 %v1130_v48 }
 0x2c9   : > { %v2590_v49 = vpop.eup %2589 }
 0x2ca   : > { %v1132_v50 = vsel %vm1079_vm3, %v2590_v49, 0.0 }
 0x2cb   : > { %1133 = vadd.xlane.f32.xlu0 %v1132_v50 }
 0x2e1   : > { %1411 = vrot.lane.b32.xlu0 %v3286_v37, %s2827_s26 }
 0x32a   : > { %v1241_v51 = vpop.xlane.xlu1 %1240 }
 0x32b   : > { %v1242_v52 = vsub.f32 %v1233_v41, %v1241_v51 }
 0x32d   : > { %v1243_v53 = vmul.f32 1.442695, %v1242_v52 }
 0x32e   : > { %v1253_v58 = vpop.permute.xlu1 %1252 }
 0x32f   : > { %2591 = vpow2.f32 %v1243_v53  ;;  %v1258_v61 = vsel %vm1141_vm4, %v1253_v58, 0 }
 0x33c   : > { %v2592_v54 = vpop.eup %2591 }
 0x33d   : > { %v1245_v55 = vsel %vm1079_vm3, %v2592_v54, 0.0 }
 0x33e   : > { %1246 = vadd.xlane.f32.xlu1 %v1245_v55 }
 0x34f   : > { %1351 = vrot.lane.b32.xlu1 %v3253_v18, %s2827_s26 }
 0x353   : > { %1349 = vrot.lane.b32.xlu1 %v3259_v22, %s2827_s26 }
 0x354   : > { %v1134_v56 = vpop.xlane.xlu0 %1133 }
 0x355   : > { %2593 = vrcp.f32 %v1134_v56 }
 0x358   : > { %v1412_v13 = vpop.permute.xlu0 %1411 }
 0x359   : > { %v1417_v17 = vsel %vm1141_vm4, %v1412_v13, 0 }
 0x362   : > { %v2594_v57 = vpop.eup %2593 }
 0x363   : > { %v1136_v59 = vmul.f32 %v2594_v57, %v2590_v49 }
 0x365   : > { %v1137_v60 = vpack.c.bf16 %v1136_v59, %v1136_v59 }
 0x367   : > { %2375 = vmatmul.mubr.msk.bf16.vlgmr.msra.gmra.mxu0 %vm1079_vm3, %v1137_v60 }
 0x368   : > { %2385 = vmatpush3.bf16.msra.mxu0 %v1258_v61  ;;  %2386 = vmatprep.mubr.msk.bf16.mxu0 %vm2825_vm1, %v2824_v2 }
 0x369   : > { %2396 = vmatprep.subr.bf16.mxu0 %v2824_v2 }
 0x3c7   : > { %v1247_v0 = vpop.xlane.xlu1 %1246 }
 0x3c8   : > { %2595 = vrcp.f32 %v1247_v0  ;;  %v1625_v0 = vsel %vm1141_vm4, %v2272_v63, 0 }
 0x3cb   : > { %v1352_v5 = vpop.permute.xlu1 %1351 }
 0x3cc   : > { %v1357_v7 = vsel %vm1079_vm3, %v1352_v5, 0 }
 0x3cf   : > { %v1350_v8 = vpop.permute.xlu1 %1349 }
 0x3d5   : > { %v2596_v1 = vpop.eup %2595 }
 0x3d6   : > { %v1249_v3 = vmul.f32 %v2596_v1, %v2592_v54 }
 0x3d8   : > { %v1250_v6 = vpack.c.bf16 %v1249_v3, %v1249_v3 }
 0x3da   : > { %2387 = vmatmul.mubr.msk.bf16.vlgmr.msra.gmra.mxu0 %vm1079_vm3, %v1250_v6  ;;  %v1186_v6 = vld [vmem:[%s3587_s19] sm:$0xf] }
 0x3db   : > { %2397 = vmatpush3.bf16.xpose.msra.mxu0 %v1357_v7  ;;  %2398 = vmatprep.mubr.msk.bf16.mxu0 %vm2825_vm1, %v2824_v2 }
 0x3dc   : > { %2408 = vmatprep.subr.bf16.mxu0 %v2824_v2 }
 0x3e2   : > { %2399 = vmatmul.mubr.msk.bf16.vlgmr.msra.gmra.mxu0 %vm1079_vm3, %v1350_v8 }
 0x3e3   : > { %2410 = vmatprep.mubr.msk.bf16.mxu0 %vm2825_vm1, %v2824_v2 }
 0x427   : > { %v3315_v9 = vpop.f32.mrf.mxu0 }
 0x429   : > { %v2376_v10 = vpop.f32.mrf.mxu0 }
 0x42a   : > { %v1671_v10 = vsel %vm1141_vm4, %v1186_v6, 0 }
 0x42b   : > { %v1182_v11 = vpop.f32.mrf.mxu0 }
 0x42c   : > { %v1185_v11 = vpack.c.bf16 %v3315_v9, %v3315_v9 }
 0x42d   : > { %v2377_v12 = vpop.f32.mrf.mxu0 }
 0x49a   : > { %v1294_v14 = vpop.f32.mrf.mxu0 }
 0x49b   : > { %v1300_v15 = vpack.c.bf16 %v1294_v14, %v1294_v14 }
 0x49c   : > { %v2388_v16 = vpop.f32.mrf.mxu0 }
 0x49d   : > { %2393 = vmatmul.mubr.msk.bf16.vlgmr.msra.gmra.mxu1 %vm1079_vm3, %v1300_v15 }
 0x49e   : > { %2403 = vmatpush3.bf16.msra.mxu1 %v1417_v17  ;;  %v1297_v19 = vpop.f32.mrf.mxu0  ;;  %2404 = vmatprep.mubr.msk.bf16.mxu1 %vm2825_vm1, %v2824_v2 }
 0x49f   : > { %2414 = vmatprep.subr.bf16.mxu1 %v2824_v2 }
 0x4a0   : > { %v2389_v20 = vpop.f32.mrf.mxu0 }
 0x4a2   : > { %v1393_v21 = vpop.f32.mrf.mxu0 }
 0x4a3   : > { %v1399_v23 = vsel %vm1079_vm3, %v1393_v21, -inf }
 0x4a4   : > { %1400 = vmax.xlane.f32.xlu1 %v1399_v23  ;;  %v2400_v24 = vpop.f32.mrf.mxu0 }
 0x4a6   : > { %v1396_v25 = vpop.f32.mrf.mxu0 }
 0x4a7   : > { %v2275_v25 = vld [vmem:[%s3589_s8] ss:$0 sm:$0xff] }
 0x4a8   : > { %v2401_v26 = vpop.f32.mrf.mxu0 }
 0x52d   : > { %v1401_v27 = vpop.xlane.xlu1 %1400 }
 0x52e   : > { %v1402_v28 = vsub.f32 %v1393_v21, %v1401_v27 }
 0x530   : > { %v1403_v29 = vmul.f32 1.442695, %v1402_v28 }
 0x532   : > { %2597 = vpow2.f32 %v1403_v29 }
 0x53f   : > { %v2598_v30 = vpop.eup %2597 }
 0x540   : > { %v1405_v31 = vsel %vm1079_vm3, %v2598_v30, 0.0 }
 0x541   : > { %1406 = vadd.xlane.f32.xlu0 %v1405_v31 }
 0x557   : > { %1510 = vrot.lane.b32.xlu0 %v3253_v18, %s2828_s2 }
 0x55b   : > { %1508 = vrot.lane.b32.xlu0 %v3259_v22, %s2828_s2  ;;  %v2268_v22 = vld [vmem:[%s3587_s19 + $0x8] sm:$0xf] }
 0x55c   : > { %v1466_v43 = vsel %vm1141_vm4, %v2268_v22, 0 }
 0x55d   : > { %v3328_v32 = vpop.f32.mrf.mxu1  ;;  %2409 = vmatpush3.bf16.msra.mxu0 %v1466_v43 }
 0x55e   : > { %2420 = vmatprep.subr.bf16.mxu0 %v2824_v2 }
 0x55f   : > { %v2394_v33 = vpop.f32.mrf.mxu1 }
 0x561   : > { %v1346_v34 = vpop.f32.mrf.mxu1 }
 0x563   : > { %v2395_v35 = vpop.f32.mrf.mxu1 }
 0x564   : > { %v2583_v35 = vld [vmem:[%s712_s15 + $0x8] sm:$0xff]  }
 0x5ca   : > { %v1407_v36 = vpop.xlane.xlu0 %1406 }
 0x5cb   : > { %2599 = vrcp.f32 %v1407_v36  ;;  %v2584_v36 = vld [vmem:[%s712_s15] sm:$0xff]  }
 0x5ce   : > { %v1511_v40 = vpop.permute.xlu0 %1510 }
 0x5cf   : > { %v1516_v42 = vsel %vm1079_vm3, %v1511_v40, 0 }
 0x5d2   : > { %v1509_v18 = vpop.permute.xlu0 %1508 }
 0x5d8   : > { %v2600_v38 = vpop.eup %2599 }
 0x5d9   : > { %v1409_v39 = vmul.f32 %v2600_v38, %v2598_v30  ;;  %v2585_v38 = vld [vmem:[%s3200_s16 + $0x18] sm:$0xff]  }
 0x5db   : > { %v1410_v41 = vpack.c.bf16 %v1409_v39, %v1409_v39 }
 0x5dd   : > { %2405 = vmatmul.mubr.msk.bf16.vlgmr.msra.gmra.mxu1 %vm1079_vm3, %v1410_v41 }
 0x5de   : > { %2415 = vmatpush3.bf16.xpose.msra.mxu1 %v1516_v42  ;;  %2416 = vmatprep.mubr.msk.bf16.mxu1 %vm2825_vm1, %v2824_v2 }
 0x5df   : > { %2426 = vmatprep.subr.bf16.mxu1 %v2824_v2 }
 0x5e5   : > { %2417 = vmatmul.mubr.msk.bf16.vlgmr.msra.gmra.mxu1 %vm1079_vm3, %v1509_v18 }
 0x5e6   : > { %2428 = vmatprep.mubr.msk.bf16.mxu1 %vm2825_vm1, %v2824_v2  ;;  %2427 = vmatpush3.bf16.msra.mxu1 %v1625_v0 }
 0x5e7   : > { %2438 = vmatprep.subr.bf16.mxu1 %v2824_v2 }
 0x69d   : > { %v1453_v44 = vpop.f32.mrf.mxu1 }
 0x69e   : > { %v1459_v45 = vpack.c.bf16 %v1453_v44, %v1453_v44 }
 0x69f   : > { %v2406_v46 = vpop.f32.mrf.mxu1 }
 0x6a0   : > { %2411 = vmatmul.mubr.msk.bf16.vlgmr.msra.gmra.mxu0 %vm1079_vm3, %v1459_v45  ;;  %v2276_v46 = vld [vmem:[%s3591_s6] ss:$0 sm:$0xff] }
 0x6a1   : > { %v1456_v47 = vpop.f32.mrf.mxu1  ;;  %2422 = vmatprep.mubr.msk.bf16.mxu0 %vm2825_vm1, %v2824_v2 }
 0x6a3   : > { %v2407_v48 = vpop.f32.mrf.mxu1 }
 0x6a4   : > { %v2277_v48 = vld [vmem:[%s3593_s12] ss:$0 sm:$0xff] }
 0x6a5   : > { %v1552_v49 = vpop.f32.mrf.mxu1 }
 0x6a6   : > { %v1558_v50 = vsel %vm1079_vm3, %v1552_v49, -inf }
 0x6a7   : > { %1559 = vmax.xlane.f32.xlu0 %v1558_v50  ;;  %v2418_v51 = vpop.f32.mrf.mxu1 }
 0x6a9   : > { %v1555_v52 = vpop.f32.mrf.mxu1 }
 0x6aa   : > { %v2587_v52 = vld [vmem:[%s3200_s16 + $0x8] sm:$0xff]  }
 0x6ab   : > { %v2419_v53 = vpop.f32.mrf.mxu1 }
 0x6ac   : > { %v2588_v53 = vld [vmem:[%s3200_s16] sm:$0xff]  }
 0x730   : > { %v1560_v54 = vpop.xlane.xlu0 %1559 }
 0x731   : > { %v1561_v55 = vsub.f32 %v1552_v49, %v1560_v54  ;;  %v2278_v54 = vld [vmem:[%s858_s13] ss:$0 sm:$0xff] }
 0x733   : > { %v1562_v56 = vmul.f32 1.442695, %v1561_v55 }
 0x735   : > { %2601 = vpow2.f32 %v1562_v56 }
 0x742   : > { %v2602_v57 = vpop.eup %2601 }
 0x743   : > { %v1564_v58 = vsel %vm1079_vm3, %v2602_v57, 0.0 }
 0x744   : > { %1565 = vadd.xlane.f32.xlu1 %v1564_v58 }
 0x755   : > { %1570 = vrot.lane.b32.xlu1 %v3286_v37, %s2828_s2 }
 0x760   : > { %v1502_v59 = vpop.f32.mrf.mxu0 }
 0x762   : > { %v2412_v60 = vpop.f32.mrf.mxu0 }
 0x764   : > { %v1505_v61 = vpop.f32.mrf.mxu0 }
 0x766   : > { %v2413_v62 = vpop.f32.mrf.mxu0 }
 0x7cd   : > { %v1566_v1 = vpop.xlane.xlu1 %1565 }
 0x7ce   : > { %2603 = vrcp.f32 %v1566_v1 }
 0x7d1   : > { %v1571_v3 = vpop.permute.xlu1 %1570 }
 0x7d2   : > { %v1576_v5 = vsel %vm1141_vm4, %v1571_v3, 0 }
 0x7d3   : > { %2421 = vmatpush3.bf16.msra.mxu0 %v1576_v5 }
 0x7d4   : > { %2432 = vmatprep.subr.bf16.mxu0 %v2824_v2 }
 0x7db   : > { %v2604_v37 = vpop.eup %2603 }
 0x7dc   : > { %v1568_v7 = vmul.f32 %v2604_v37, %v2602_v57 }
 0x7de   : > { %v1569_v8 = vpack.c.bf16 %v1568_v7, %v1568_v7 }
 0x7e0   : > { %2423 = vmatmul.mubr.msk.bf16.vlgmr.msra.gmra.mxu0 %vm1079_vm3, %v1569_v8 }
 0x7e1   : > { %2433 = vmatpush3.bf16.msra.mxu0 %v1671_v10  ;;  %2434 = vmatprep.mubr.msk.bf16.mxu0 %vm2825_vm1, %v2824_v2 }
 0x7e2   : > { %2446 = vmatprep.subr.bf16.mxu0 %v2824_v2 }
 0x7e8   : > { %2435 = vmatmul.mubr.msk.bf16.vlgmr.msra.gmra.mxu0 %vm1079_vm3, %v1185_v11 }
 0x7e9   : > { %2454 = vmatprep.mubr.msk.bf16.mxu0 %vm2825_vm1, %v2824_v2  ;;  %2447 = vmatpush3.bf16.msra.mxu0 %v2585_v38 }
 0x7ea   : > { %2448 = vmatprep.subr.bf16.mxu0 %v2824_v2 }
 0x8a0   : > { %v1612_v12 = vpop.f32.mrf.mxu0 }
 0x8a1   : > { %v1618_v13 = vpack.c.bf16 %v1612_v12, %v1612_v12 }
 0x8a2   : > { %v2424_v14 = vpop.f32.mrf.mxu0 }
 0x8a3   : > { %2429 = vmatmul.mubr.msk.bf16.vlgmr.msra.gmra.mxu1 %vm1079_vm3, %v1618_v13 }
 0x8a4   : > { %v1615_v15 = vpop.f32.mrf.mxu0  ;;  %2442 = vmatprep.mubr.msk.bf16.mxu1 %vm2825_vm1, %v2824_v2  ;;  %2439 = vmatpush3.bf16.msra.mxu1 %v2583_v35 }
 0x8a5   : > { %2440 = vmatprep.subr.bf16.mxu1 %v2824_v2 }
 0x8a6   : > { %v2425_v16 = vpop.f32.mrf.mxu0 }
 0x8a8   : > { %v1707_v17 = vpop.f32.mrf.mxu0  ;;  %2441 = vmatpush3.bf16.msra.mxu1 %v2584_v36 }
 0x8a9   : > { %v1708_v21 = vadd.f32 %v1707_v17, %v3328_v32 }
 0x8aa   : > { %v2436_v19 = vpop.f32.mrf.mxu0 }
 0x8ab   : > { %v1713_v23 = vadd.f32 %v1708_v21, %v1502_v59  ;;  %v2288_v19 = vld [vmem:[%s869_s27] ss:$0 sm:$0xff] }
 0x8ac   : > { %v1710_v20 = vpop.f32.mrf.mxu0 }
 0x8ae   : > { %v2437_v9 = vpop.f32.mrf.mxu0 }
 0x8af   : > { %v2289_v9 = vld [vmem:[%s872_s7] ss:$0 sm:$0xff] }
 0x963   : > { %v1661_v24 = vpop.f32.mrf.mxu1 }
 0x964   : > { %v1714_v26 = vadd.f32 %v1713_v23, %v1661_v24 }
 0x965   : > { %v2430_v27 = vpop.f32.mrf.mxu1 }
 0x966   : > { %v1722_v28 = vadd.f32 %v2275_v25, %v1714_v26 }
 0x967   : > { %v1664_v29 = vpop.f32.mrf.mxu1 }
 0x968   : > { %v1723_v30 = vadd.f32 %v1722_v28, %v3225_v4  ;;  %v2586_v4 = vld [vmem:[%s3200_s16 + $0x10] sm:$0xff]  }
 0x969   : > { %v2431_v31 = vpop.f32.mrf.mxu1  ;;  %2449 = vmatpush3.bf16.msra.mxu0 %v2586_v4 }
 0x96a   : > { %v1726_v33 = vsel %vm906_vm2, %v1723_v30, 0.0  ;;  %v1731_v32 = vmul.f32 %v1723_v30, %v1723_v30  ;;  %2450 = vmatprep.subr.bf16.mxu0 %v2824_v2 }
 0x96b   : > { %1727 = vadd.xlane.f32.xlu1 %v1726_v33 }
 0x96c   : > { %v1732_v34 = vsel %vm906_vm2, %v1731_v32, 0.0 }
 0x96d   : > { %1733 = vadd.xlane.f32.xlu0 %v1732_v34  ;;  %2451 = vmatpush3.bf16.msra.mxu0 %v2587_v52 }
 0x96e   : > { %2452 = vmatprep.subr.bf16.mxu0 %v2824_v2  ;;  %v2282_v2 = vld [vmem:[%s866_s18] ss:$0 sm:$0xff] }
 0x971   : > { %2453 = vmatpush3.bf16.msra.mxu0 %v2588_v53 }
 0x9f4   : > { %v1728_v39 = vpop.xlane.xlu1 %1727 }
 0x9f5   : > { %v1730_v40 = vmul.f32 0.03125, %v1728_v39 }
 0x9f6   : > { %v1734_v41 = vpop.xlane.xlu0 %1733 }
 0x9f7   : > { %v1736_v42 = vmul.f32 %v1730_v40, %v1730_v40  ;;  %v1735_v18 = vmul.f32 0.03125, %v1734_v41  ;;  %v1738_v44 = vsub.f32 %v1723_v30, %v1730_v40 }
 0x9f9   : > { %v1737_v22 = vsub.f32 %v1735_v18, %v1736_v42 }
 0x9fb   : > { %v1739_v43 = vadd.f32 1e-05, %v1737_v22 }
 0x9fd   : > { %2605 = vrsqrt.f32 %v1739_v43 }
 0xa0a   : > { %v2606_v45 = vpop.eup %2605 }
 0xa0b   : > { %v1741_v47 = vmul.f32 %v2606_v45, %v1738_v44 }
 0xa0d   : > { %v1748_v49 = vmul.f32 %v2276_v46, %v1741_v47 }
 0xa0f   : > { %v1755_v50 = vadd.f32 %v2277_v48, %v1748_v49 }
 0xa11   : > { %v1756_v51 = vpack.c.bf16 %v1755_v50, %v1755_v50 }
 0xa13   : > { %2443 = vmatmul.mubr.msk.bf16.vlgmr.msra.gmra.mxu1 %vm906_vm2, %v1756_v51 }
 0xad3   : > { %v1817_v55 = vpop.f32.mrf.mxu1 }
 0xad4   : > { %v1818_v56 = vadd.f32 %v2278_v54, %v1817_v55 }
 0xad5   : > { %v2444_v57 = vpop.f32.mrf.mxu1 }
 0xad6   : > { %v1823_v58 = vmax.f32 %v1818_v56, 0.0 }
 0xad7   : > { %v1820_v59 = vpop.f32.mrf.mxu1 }
 0xad8   : > { %v1824_v60 = vpack.c.bf16 %v1823_v58, %v1823_v58 }
 0xad9   : > { %v2445_v61 = vpop.f32.mrf.mxu1 }
 0xada   : > { %2455 = vmatmul.mubr.msk.bf16.vlgmr.msra.gmra.mxu0 %vm1864_vm5, %v1824_v60 }
 0xb9a   : > { %v1902_v62 = vpop.f32.mrf.mxu0 }
 0xb9b   : > { %v1903_v63 = vadd.f32 %v2282_v2, %v1902_v62 }
 0xb9c   : > { %v2456_v0 = vpop.f32.mrf.mxu0 }
 0xb9d   : > { %v1908_v1 = vadd.f32 %v1903_v63, %v1755_v50 }
 0xb9e   : > { %v1905_v3 = vpop.f32.mrf.mxu0 }
 0xb9f   : > { %v1911_v5 = vsel %vm906_vm2, %v1908_v1, 0.0  ;;  %v1915_v37 = vmul.f32 %v1908_v1, %v1908_v1 }
 0xba0   : > { %1912 = vadd.xlane.f32.xlu0 %v1911_v5  ;;  %v2457_v6 = vpop.f32.mrf.mxu0 }
 0xba1   : > { %v1916_v7 = vsel %vm906_vm2, %v1915_v37, 0.0 }
 0xba4   : > { %1917 = vadd.xlane.f32.xlu0 %v1916_v7 }
 0xc29   : > { %v1913_v8 = vpop.xlane.xlu0 %1912 }
 0xc2a   : > { %v1914_v10 = vmul.f32 0.03125, %v1913_v8 }
 0xc2c   : > { %v1920_v12 = vmul.f32 %v1914_v10, %v1914_v10  ;;  %v1922_v16 = vsub.f32 %v1908_v1, %v1914_v10 }
 0xc2d   : > { %v1918_v11 = vpop.xlane.xlu0 %1917 }
 0xc2e   : > { %v1919_v13 = vmul.f32 0.03125, %v1918_v11 }
 0xc30   : > { %v1921_v14 = vsub.f32 %v1919_v13, %v1920_v12 }
 0xc32   : > { %v1923_v15 = vadd.f32 1e-05, %v1921_v14 }
 0xc34   : > { %2607 = vrsqrt.f32 %v1923_v15 }
 0xc41   : > { %v2608_v17 = vpop.eup %2607 }
 0xc42   : > { %v1925_v20 = vmul.f32 %v2608_v17, %v1922_v16 }
 0xc44   : > { %v1932_v21 = vmul.f32 %v2288_v19, %v1925_v20  ;;  %1944 = sbr.rel (%p2290_p9) target bundleno = 3146 (0xc4a), region = 108 }
 0xc46   : > { %v1939_v23 = vadd.f32 %v2289_v9, %v1932_v21 }
 0xc48   : > { %1940 = vst.msk [vmem:[#allocation2] sm:$0xff] %vm906_vm2, %v1939_v23 }
 0xc49   : > { %1945 = vst.msk [vmem:[%s3217_s11] sm:$0xff] %vm906_vm2, %v1939_v23 }
 0xc4a PF: > { %s3598_s23 = sld [smem:[#allocation18_spill]]  ;;  %s1960_s22 = sshll.u32 %s3217_s11, 4  ;;  %s1961_s22 = int_to_ptr.vmem [resolvable:$true] %s1960_s22 }
 0xc4b   : > { %s3599_s27 = sld [smem:[#allocation25_spill]]  ;;  %s1947_s15 = scalar_lea.sflag [#allocation5], %s3127_s3 }
 0xc4c   : > { %s3600_s21 = sld [smem:[#allocation45_spill]]  ;;  %s2693_s20 = scalar_lea.vmem %s1961_s22, 128 }
 0xc4d   : > { %p2694_p1 = scmp.ne.s32.totalorder %s1961_s22, %s2693_s20  ;;  %s2829_s0 = smov [#allocation9]  }
 0xc4e   : > { %s2697_s6 = sshll.u32 %s2829_s0, 4  ;;  %s2698_s6 = int_to_ptr.vmem [resolvable:$false] %s2697_s6 }
 0xc4f   : > { %s2699_s30 = scalar_lea.vmem %s2698_s6, 256  ;;  %p2700_p7 = scmp.lt.s32.totalorder %s1961_s22, %s2698_s6 }
 0xc50   : > { %s2292_s1 = sshll.u32 %s3598_s23, 7  ;;  %p2701_p12 = scmp.lt.s32.totalorder %s2699_s30, %s2693_s20 }
 0xc51   : > { %p3601_p5 = scmp.ne.s32.totalorder %s3599_s27, 0 }
 0xc52   : > { %s1958_s7 = scalar_lea.hbm %s3600_s21, %s2292_s1  ;;  %p2702_p2 = por %p2701_p12, %p2700_p7 }
 0xc53   : > { %p2695_p10 = pnand %p2694_p1, %p3601_p5 }
 0xc55   : > { %p2696_p3 = pneg %p2695_p10 }
 0xc57   : > { %p2703_p8 = pnand %p2702_p2, %p2696_p3 }
 0xc59   : > { %2706 = shalt.err (!%p2703_p8)
}
 0xc5a   : > { %s2707_s24 = scalar_lea.hbm %s1958_s7, 128  ;;  %s2711_s5 = scalar_lea.hbm %s3600_s21, 256 }
 0xc5b   : > { %p2708_p0 = scmp.ne.s32.totalorder %s1958_s7, %s2707_s24  ;;  %p2712_p4 = scmp.lt.s32.totalorder %s1958_s7, %s3600_s21 }
 0xc5c   : > { %p2713_p6 = scmp.lt.s32.totalorder %s2711_s5, %s2707_s24 }
 0xc5d   : > { %p2709_p11 = pnand %p2708_p0, %p3601_p5 }
 0xc5e   : > { %p2714_p9 = por %p2713_p6, %p2712_p4 }
 0xc5f   : > { %p2710_p13 = pneg %p2709_p11 }
 0xc61   : > { %p2715_p1 = pnand %p2714_p9, %p2710_p13 }
 0xc63   : > { %2718 = shalt.err (!%p2715_p1)
}
 0xc64   : > { %2464 = dma.vmem_to_hbm [thread:$0]  (%p3601_p5), %s1961_s22, 128, %s1958_s7, %s1947_s15  }
 0xc65 PF: > { %s3602_s28 = sld [smem:[#allocation21_spill]] }
 0xc66   : > { %s3603_s17 = sld [smem:[#allocation15_spill]] }
 0xc67   : > { %s3604_s9 = sld [smem:[#allocation27_spill]] }
 0xc6b   : > { %p2481_p10 = scmp.ge.s32.totalorder %s3602_s28, 2 }
 0xc6c   : > { %s1972_s25 = sand.u32 1, %s3603_s17  }
 0xc6d   : > { %p3605_p3 = scmp.ne.s32.totalorder %s3604_s9, 0  ;;  %s1973_s14 = scalar_lea.sflag [#allocation5], %s1972_s25 }
 0xc6f   : > { %p2477_p7 = pnand %p2481_p10, %p3605_p3 }
 0xc71   : > { %p2478_p12 = pneg %p2477_p7 }
 0xc73   : > { %2772 = dma.done.wait (%p2478_p12), %s1973_s14, 128  }
 0xc74   : > { %2774 = vsyncadd (%p2478_p12), %s1973_s14, 4294967168  ;;  %s36_s1 = sadd.s32 1, %s3602_s28   ;;  %s3606_s24 = sld [smem:[#allocation13_spill]] }
 0xc75   : > { %p33_p2 = scmp.ge.s32.totalorder %s36_s1, 6   ;;  %s3607_s25 = sld [smem:[#allocation14_spill]] }
 0xc76   : > { %s3608_s26 = sld [smem:[#allocation23_spill]] }
 0xc77   : > { %s3609_s27 = sld [smem:[#allocation16_spill]] }
 0xc78   : > { %s3610_s28 = sld [smem:[#allocation17_spill]] }
 0xc79   : > { %s3611_s29 = sld [smem:[#allocation26_spill]]  ;;  %35 = sbr.rel (!%p33_p2) target bundleno = 29 (0x1d), region = 210 }
 0xc7a   : > { %s3612_s0 = sld [smem:[#allocation19_spill]] }
 0xc7b   : > { %s3613_s30 = sld [smem:[#allocation20_spill]] }
 0xc7c   : > { %s3614_s18 = sld [smem:[#allocation22_spill]] }
 0xc7d   : > { %s3615_s19 = sld [smem:[#allocation24_spill]] }
 0xc7e   :  { %1978 = vsyncpa [#allocation4], 1 }
 0xc7f   :  { %1980 = vsyncpa [#allocation4 + $0x1], 1 }
 0xc80   :  { %1981 = vsyncpa [#allocation7], 1 }
 0xc81   :  { %1983 = vsyncpa [#allocation7 + $0x1], 1 }
 0xc82   :  { %1984 = vsyncpa [#allocation5], 1 }
 0xc83   :  { %1986 = vsyncpa [#allocation5 + $0x1], 1 }

</bundles_post_ra>
